<compile_context>
chip_gen: v6e
topology: v6e:2x2x1
jax: 0.10.0
libtpu: 0.0.40
codegen_flags: <defaults>
</compile_context>

<pallas_src>
import functools

import jax
import jax.numpy as jnp
from jax import lax
from jax.experimental import pallas as pl
from jax.experimental.pallas import tpu as pltpu


# ---------------------------------------------------------------------------
# Kernels
# ---------------------------------------------------------------------------

def _kv_proj_kernel(k_ref, v_ref, wk_ref, wv_ref, kp_ref, vp_ref):
    """Shared per-head K/V projection on flat (rows=N*S*heads, hd) operands.

    One big M=rows matmul per tensor (no per-head weight replication), bf16 MXU
    operands, f32 accumulation, bf16 outputs.
    """
    kp_ref[...] = jnp.dot(k_ref[...].astype(jnp.bfloat16), wk_ref[...],
                          preferred_element_type=jnp.float32).astype(jnp.bfloat16)
    vp_ref[...] = jnp.dot(v_ref[...].astype(jnp.bfloat16), wv_ref[...],
                          preferred_element_type=jnp.float32).astype(jnp.bfloat16)


def _attn_ln_kernel(*refs, mask_mode, heads, hd, tq, tk, scale):
    """Flash attention over kv tiles, fused with LayerNorm(attn_out + residual).

    refs (mask_mode == "dense" adds mask_ref after vp_ref):
      q_ref    : (1, tq, E)  raw queries (f32) -- projected at ki==0, residual at last ki
      kp_ref   : (1, tk, E)  pre-projected keys  (bf16)
      vp_ref   : (1, tk, E)  pre-projected values (bf16)
      wq_ref   : (hd, hd)    shared per-head Wq^T (bf16, 1/sqrt(E) folded in)
      wo_ref   : (E, E)      fc_out W^T (bf16)
      bo/g/beta: (1, E)      f32
      o_ref    : (1, tq, E)  written only at the last kv step
    scratch: qp (tq, E) bf16; m, l (heads, tq, 1) f32; acc (tq, E) f32.
    """
    if mask_mode == "dense":
        (q_ref, kp_ref, vp_ref, mask_ref,
         wq_ref, wo_ref, bo_ref, g_ref, beta_ref,
         o_ref, qp_scr, m_scr, l_scr, acc_scr) = refs
    else:
        (q_ref, kp_ref, vp_ref,
         wq_ref, wo_ref, bo_ref, g_ref, beta_ref,
         o_ref, qp_scr, m_scr, l_scr, acc_scr) = refs
        mask_ref = None

    qi = pl.program_id(1)
    ki = pl.program_id(2)

    @pl.when(ki == 0)
    def _init():
        m_scr[...] = jnp.full(m_scr.shape, -jnp.inf, dtype=jnp.float32)
        l_scr[...] = jnp.zeros(l_scr.shape, dtype=jnp.float32)
        acc_scr[...] = jnp.zeros(acc_scr.shape, dtype=jnp.float32)
        # Q projection hoisted out of the kv loop; shared per-head weight applied on
        # 128-lane-aligned head slices; 1/sqrt(E) already folded into wq.
        qb = q_ref[0].astype(jnp.bfloat16)                               # (tq, E)
        for h in range(heads):
            sl = slice(h * hd, (h + 1) * hd)
            qp_scr[:, sl] = jnp.dot(
                qb[:, sl], wq_ref[...],
                preferred_element_type=jnp.float32).astype(jnp.bfloat16)

    def _update():
        kp = kp_ref[0]                                                   # (tk, E) bf16
        vp = vp_ref[0]                                                   # (tk, E) bf16
        qp = qp_scr[...]                                                 # (tq, E) bf16
        if mask_mode == "dense":
            bias = jnp.where(mask_ref[0] == 0.0,
                             jnp.float32(-1e20 * scale), jnp.float32(0.0))
        elif mask_mode == "causal":
            rows = qi * tq + lax.broadcasted_iota(jnp.int32, (tq, tk), 0)
            cols = ki * tk + lax.broadcasted_iota(jnp.int32, (tq, tk), 1)
            bias = jnp.where(cols <= rows, jnp.float32(0.0), jnp.float32(-1e30))
        else:
            bias = None
        for h in range(heads):
            sl = slice(h * hd, (h + 1) * hd)
            s = lax.dot_general(qp[:, sl], kp[:, sl],
                                (((1,), (1,)), ((), ())),
                                preferred_element_type=jnp.float32)      # (tq, tk)
            if bias is not None:
                s = s + bias
            m_prev = m_scr[h]                                            # (tq, 1)
            m_new = jnp.maximum(m_prev, jnp.max(s, axis=-1, keepdims=True))
            alpha = jnp.exp(m_prev - m_new)
            p = jnp.exp(s - m_new)                                       # f32
            l_scr[h] = alpha * l_scr[h] + jnp.sum(p, axis=-1, keepdims=True)
            acc_scr[:, sl] = alpha * acc_scr[:, sl] + jnp.dot(
                p.astype(jnp.bfloat16), vp[:, sl],
                preferred_element_type=jnp.float32)
            m_scr[h] = m_new

    if mask_mode == "causal":
        # Skip fully-masked (qi, ki) tiles (their K/V DMA is also skipped via the
        # clamped kv index_map in the wrapper).
        @pl.when(ki * tk <= qi * tq + (tq - 1))
        def _():
            _update()
    else:
        _update()

    @pl.when(ki == pl.num_programs(2) - 1)
    def _finalize():
        # Exact reciprocal: runs once per q tile, negligible cost, avoids the
        # approx-reciprocal error noted in the review.
        inv = 1.0 / l_scr[...]                                           # (heads, tq, 1)
        for h in range(heads):
            sl = slice(h * hd, (h + 1) * hd)
            acc_scr[:, sl] = acc_scr[:, sl] * inv[h]
        attn = acc_scr[...].astype(jnp.bfloat16)                         # (tq, E)
        # fc_out as one K=E matmul (accumulator is already lane-flat).
        out = jnp.dot(attn, wo_ref[...],
                      preferred_element_type=jnp.float32) + bo_ref[...]
        # Fused residual add + LayerNorm (eps=1e-5, biased variance), all f32.
        x = out + q_ref[0]
        mean = jnp.mean(x, axis=-1, keepdims=True)
        var = jnp.mean((x - mean) ** 2, axis=-1, keepdims=True)
        y = (x - mean) * lax.rsqrt(var + 1e-5)
        o_ref[0] = (y * g_ref[...] + beta_ref[...]).astype(o_ref.dtype)


def _ffn_ln_kernel(x_ref, w1_ref, b1_ref, w2_ref, b2_ref, g_ref, beta_ref, o_ref):
    """out = LayerNorm(relu(x @ W1 + b1) @ W2 + b2 + x); bf16 MXU operands, f32 stats."""
    x = x_ref[...]                                                       # (tm, E) f32
    h = jnp.dot(x.astype(jnp.bfloat16), w1_ref[...],
                preferred_element_type=jnp.float32) + b1_ref[...]
    h = jnp.maximum(h, 0.0)
    f = jnp.dot(h.astype(jnp.bfloat16), w2_ref[...],
                preferred_element_type=jnp.float32) + b2_ref[...]
    y = f + x
    mean = jnp.mean(y, axis=-1, keepdims=True)
    var = jnp.mean((y - mean) ** 2, axis=-1, keepdims=True)
    out = (y - mean) * lax.rsqrt(var + 1e-5)
    o_ref[...] = (out * g_ref[...] + beta_ref[...]).astype(o_ref.dtype)


# ---------------------------------------------------------------------------
# Wrappers (pallas_call plumbing)
# ---------------------------------------------------------------------------

_VMEM_LIMIT = 32 * 1024 * 1024  # ~actual need; safe on v5e/v6e/v7x (review #10)


def kv_head_projection(keys, values, wk_t, wv_t, *, heads, block_rows=1024):
    """Apply the shared per-head (hd, hd) K/V Linear once, as flat-row matmuls."""
    N, S, E = keys.shape
    hd = E // heads
    rows = N * S * heads
    tm = min(block_rows, rows)
    assert rows % tm == 0, "demo requires N*S*heads divisible by the row tile"
    k2 = keys.reshape(rows, hd)     # row-major contiguous reshape (no transpose)
    v2 = values.reshape(rows, hd)

    kp, vp = pl.pallas_call(
        _kv_proj_kernel,
        out_shape=(jax.ShapeDtypeStruct((rows, hd), jnp.bfloat16),
                   jax.ShapeDtypeStruct((rows, hd), jnp.bfloat16)),
        grid=(rows // tm,),
        in_specs=[
            pl.BlockSpec((tm, hd), lambda i: (i, 0)),
            pl.BlockSpec((tm, hd), lambda i: (i, 0)),
            pl.BlockSpec((hd, hd), lambda i: (0, 0)),
            pl.BlockSpec((hd, hd), lambda i: (0, 0)),
        ],
        out_specs=(pl.BlockSpec((tm, hd), lambda i: (i, 0)),
                   pl.BlockSpec((tm, hd), lambda i: (i, 0))),
        compiler_params=pltpu.CompilerParams(dimension_semantics=("parallel",)),
    )(k2, v2, wk_t, wv_t)
    return kp.reshape(N, S, E), vp.reshape(N, S, E)


def self_attention_ln(values, keys, queries, mask, attn_p, gamma, beta, *,
                      heads, causal=False, block_q=256, block_kv=256):
    """LayerNorm(SelfAttention(values, keys, queries, mask) + queries).

    mask handling: causal=True -> in-kernel iota mask + masked-tile skipping (the
    `mask` argument is ignored); mask=None -> no masking; else a dense (N,Sq,Skv)
    float mask (0 = masked) is streamed.
    """
    N, Sq, E = queries.shape
    Skv = keys.shape[1]
    hd = E // heads
    assert hd % 128 == 0, "demo requires head_dim to be a multiple of 128"
    tq = min(block_q, Sq)
    tk = min(block_kv, Skv)
    assert Sq % tq == 0 and Skv % tk == 0, "demo requires seq divisible by tile size"

    # K/V projected once per attention call (not once per q tile / kv step).
    kp, vp = kv_head_projection(keys, values, attn_p["wk_t"], attn_p["wv_t"],
                                heads=heads)

    if causal:
        mask_mode = "causal"
    elif mask is None:
        mask_mode = "none"
    else:
        mask_mode = "dense"

    kern = functools.partial(_attn_ln_kernel, mask_mode=mask_mode, heads=heads,
                             hd=hd, tq=tq, tk=tk, scale=1.0 / float(E) ** 0.5)
    grid = (N, Sq // tq, Skv // tk)

    if mask_mode == "causal":
        # Clamp fully-masked kv steps to the last relevant (diagonal) block so their
        # K/V tiles are not re-DMA'd; the kernel skips their compute.
        def kv_idx(b, qi, ki):
            last_k = (qi * tq + (tq - 1)) // tk
            return (b, jnp.minimum(ki, last_k), 0)
    else:
        def kv_idx(b, qi, ki):
            return (b, ki, 0)

    in_specs = [
        pl.BlockSpec((1, tq, E), lambda b, qi, ki: (b, qi, 0)),   # raw queries
        pl.BlockSpec((1, tk, E), kv_idx),                         # projected K (bf16)
        pl.BlockSpec((1, tk, E), kv_idx),                         # projected V (bf16)
    ]
    args = [queries, kp, vp]
    if mask_mode == "dense":
        in_specs.append(pl.BlockSpec((1, tq, tk), lambda b, qi, ki: (b, qi, ki)))
        args.append(mask)
    in_specs += [
        pl.BlockSpec((hd, hd), lambda b, qi, ki: (0, 0)),         # Wq^T (scaled, bf16)
        pl.BlockSpec((E, E), lambda b, qi, ki: (0, 0)),           # Wo^T (bf16)
        pl.BlockSpec((1, E), lambda b, qi, ki: (0, 0)),           # bo
        pl.BlockSpec((1, E), lambda b, qi, ki: (0, 0)),           # LN gamma
        pl.BlockSpec((1, E), lambda b, qi, ki: (0, 0)),           # LN beta
    ]
    args += [attn_p["wq_t"], attn_p["wo_t"], attn_p["bo"],
             gamma.reshape(1, E), beta.reshape(1, E)]

    return pl.pallas_call(
        kern,
        out_shape=jax.ShapeDtypeStruct((N, Sq, E), queries.dtype),
        grid=grid,
        in_specs=in_specs,
        out_specs=pl.BlockSpec((1, tq, E), lambda b, qi, ki: (b, qi, 0)),
        scratch_shapes=[
            pltpu.VMEM((tq, E), jnp.bfloat16),          # projected Q (hoisted)
            pltpu.VMEM((heads, tq, 1), jnp.float32),    # running max
            pltpu.VMEM((heads, tq, 1), jnp.float32),    # running denom
            pltpu.VMEM((tq, E), jnp.float32),           # PV accumulator (lane-flat)
        ],
        compiler_params=pltpu.CompilerParams(
            dimension_semantics=("parallel", "parallel", "arbitrary"),
            vmem_limit_bytes=_VMEM_LIMIT),
    )(*args)


def feed_forward_ln(x, w1_t, b1, w2_t, b2, gamma, beta, *, block_rows=512):
    """LayerNorm(FFN(x) + x), row-tiled over the flattened (N*S) axis."""
    N, S, E = x.shape
    hid = w1_t.shape[1]
    rows = N * S
    tm = min(block_rows, rows)
    assert rows % tm == 0, "demo requires N*S divisible by the row tile"
    x2 = x.reshape(rows, E)

    out = pl.pallas_call(
        _ffn_ln_kernel,
        out_shape=jax.ShapeDtypeStruct((rows, E), x.dtype),
        grid=(rows // tm,),
        in_specs=[
            pl.BlockSpec((tm, E), lambda i: (i, 0)),
            pl.BlockSpec((E, hid), lambda i: (0, 0)),
            pl.BlockSpec((1, hid), lambda i: (0, 0)),
            pl.BlockSpec((hid, E), lambda i: (0, 0)),
            pl.BlockSpec((1, E), lambda i: (0, 0)),
            pl.BlockSpec((1, E), lambda i: (0, 0)),
            pl.BlockSpec((1, E), lambda i: (0, 0)),
        ],
        out_specs=pl.BlockSpec((tm, E), lambda i: (i, 0)),
        compiler_params=pltpu.CompilerParams(
            dimension_semantics=("parallel",),
            vmem_limit_bytes=_VMEM_LIMIT),
    )(x2, w1_t, b1, w2_t, b2, gamma.reshape(1, E), beta.reshape(1, E))
    return out.reshape(N, S, E)


# ---------------------------------------------------------------------------
# DecoderBlock forward (parameter setup + kernel composition)
# ---------------------------------------------------------------------------

def init_self_attention_params(key, emb_size, heads):
    hd = emb_size // heads
    k1, k2, k3, k4, k5 = jax.random.split(key, 5)
    wk = jax.random.normal(k1, (hd, hd), jnp.float32) * 0.1
    wv = jax.random.normal(k2, (hd, hd), jnp.float32) * 0.1
    wq = jax.random.normal(k3, (hd, hd), jnp.float32) * 0.1
    wo = jax.random.normal(k4, (emb_size, emb_size), jnp.float32) * 0.1
    bo = jax.random.normal(k5, (emb_size,), jnp.float32) * 0.1
    scale = 1.0 / float(emb_size) ** 0.5
    return {
        # Shared per-head Linear y = x @ W.T; 1/sqrt(E) softmax scale folded into Wq.
        # Weights stored in bf16 (MXU-native operand dtype; f32 accumulation in-kernel).
        "wq_t": (wq.T * scale).astype(jnp.bfloat16),
        "wk_t": wk.T.astype(jnp.bfloat16),
        "wv_t": wv.T.astype(jnp.bfloat16),
        "wo_t": wo.T.astype(jnp.bfloat16),          # fc_out weight (E, E)
        "bo": bo.reshape(1, emb_size),               # f32
    }


def init_decoder_params(key, emb_size, heads, forward_expansion):
    ks = jax.random.split(key, 6)
    hid = emb_size * forward_expansion
    w1 = jax.random.normal(ks[2], (hid, emb_size), jnp.float32) * 0.1
    b1 = jax.random.normal(ks[3], (hid,), jnp.float32) * 0.1
    w2 = jax.random.normal(ks[4], (emb_size, hid), jnp.float32) * 0.1
    b2 = jax.random.normal(ks[5], (emb_size,), jnp.float32) * 0.1
    return {
        "self_attn": init_self_attention_params(ks[0], emb_size, heads),
        "tb_attn": init_self_attention_params(ks[1], emb_size, heads),
        # LayerNorm params: PyTorch default init (gamma=1, beta=0)
        "norm_g": jnp.ones((emb_size,), jnp.float32),
        "norm_b": jnp.zeros((emb_size,), jnp.float32),
        "norm1_g": jnp.ones((emb_size,), jnp.float32),
        "norm1_b": jnp.zeros((emb_size,), jnp.float32),
        "norm2_g": jnp.ones((emb_size,), jnp.float32),
        "norm2_b": jnp.zeros((emb_size,), jnp.float32),
        "w1_t": w1.T.astype(jnp.bfloat16), "b1": b1.reshape(1, hid),
        "w2_t": w2.T.astype(jnp.bfloat16), "b2": b2.reshape(1, emb_size),
    }


def decoder_block(x, value, key_t, src_mask, trg_mask, params, *, heads,
                  trg_causal=False):
    """DecoderBlock.forward; dropout = identity (eval mode).

    If trg_causal=True, the target mask is generated in-kernel (trg_mask ignored);
    src_mask may be None (no source masking) or a dense (N, Sq, Skv) float mask.
    """
    # Masked self-attention + residual + LayerNorm (params["norm*"])
    query = self_attention_ln(x, x, x, trg_mask, params["self_attn"],
                              params["norm_g"], params["norm_b"],
                              heads=heads, causal=trg_causal)
    # TransformBlock: cross-attention + norm1, then FFN + norm2.
    h = self_attention_ln(value, key_t, query, src_mask, params["tb_attn"],
                          params["norm1_g"], params["norm1_b"], heads=heads)
    return feed_forward_ln(h, params["w1_t"], params["b1"], params["w2_t"],
                           params["b2"], params["norm2_g"], params["norm2_b"])


# ---------------------------------------------------------------------------
# Pure-JAX reference (mirrors the kernel's bf16 MXU-operand precision so the
# correctness check isolates tiling/fusion logic rather than dtype choice).
# ---------------------------------------------------------------------------

def _ref_attention(values, keys, queries, mask, p, heads):
    N, Sq, E = queries.shape
    hd = E // heads

    def proj(x, w_t):
        xh = x.reshape(N, -1, heads, hd).astype(jnp.bfloat16)
        return jnp.einsum('nkhd,de->nkhe', xh, w_t,
                          preferred_element_type=jnp.float32).astype(jnp.bfloat16)

    qp = proj(queries, p["wq_t"])    # scale already folded into wq_t
    kp = proj(keys, p["wk_t"])
    vp = proj(values, p["wv_t"])
    s = jnp.einsum('nqhd,nkhd->nhqk', qp, kp, preferred_element_type=jnp.float32)
    if mask is not None:
        s = s + jnp.where(mask[:, None, :, :] == 0.0, jnp.float32(-1e30),
                          jnp.float32(0.0))
    m = jnp.max(s, axis=-1, keepdims=True)
    pm = jnp.exp(s - m)
    l = jnp.sum(pm, axis=-1, keepdims=True)                      # (N, H, Sq, 1)
    out_h = jnp.einsum('nhqk,nkhd->nqhd', pm.astype(jnp.bfloat16), vp,
                       preferred_element_type=jnp.float32)
    out_h = out_h / l.transpose(0, 2, 1, 3)
    attn = out_h.reshape(N, Sq, E).astype(jnp.bfloat16)
    return jnp.dot(attn, p["wo_t"], preferred_element_type=jnp.float32) + p["bo"]


def _ref_add_ln(a, b, g, bt):
    x = a + b
    m = x.mean(-1, keepdims=True)
    v = ((x - m) ** 2).mean(-1, keepdims=True)
    return (x - m) * lax.rsqrt(v + 1e-5) * g + bt


def _ref_decoder(x, value, key_t, src_mask, trg_mask, p, heads):
    a = _ref_attention(x, x, x, trg_mask, p["self_attn"], heads)
    q = _ref_add_ln(a, x, p["norm_g"], p["norm_b"])
    a2 = _ref_attention(value, key_t, q, src_mask, p["tb_attn"], heads)
    h = _ref_add_ln(a2, q, p["norm1_g"], p["norm1_b"])
    ffh = jnp.dot(h.astype(jnp.bfloat16), p["w1_t"],
                  preferred_element_type=jnp.float32) + p["b1"]
    ffh = jnp.maximum(ffh, 0.0)
    ff = jnp.dot(ffh.astype(jnp.bfloat16), p["w2_t"],
                 preferred_element_type=jnp.float32) + p["b2"]
    return _ref_add_ln(ff, h, p["norm2_g"], p["norm2_b"])


# ---------------------------------------------------------------------------

if __name__ == "__main__":
    # Small but TPU-aligned shapes: E, hd, FFN hidden multiples of 128; seq tiles of 128+.
    N, S, E, HEADS, FE = 2, 256, 512, 4, 4

    root = jax.random.PRNGKey(0)
    kx, kval, kkey, kpar = jax.random.split(root, 4)
    x = jax.random.normal(kx, (N, S, E), jnp.float32)
    value = jax.random.normal(kval, (N, S, E), jnp.float32)
    key_t = jax.random.normal(kkey, (N, S, E), jnp.float32)
    params = init_decoder_params(kpar, E, HEADS, FE)

    # Fast path: causal target mask generated in-kernel, no source mask streamed.
    out = decoder_block(x, value, key_t, None, None, params, heads=HEADS,
                        trg_causal=True)
    out = jax.block_until_ready(out)
    assert out.shape == (N, S, E)

    # Reference (same semantics, mirrored bf16 MXU operand precision).
    trg_mask = jnp.tril(jnp.ones((S, S), jnp.float32))[None].repeat(N, axis=0)
    ref = _ref_decoder(x, value, key_t, None, trg_mask, params, HEADS)
    err = float(jnp.max(jnp.abs(out - ref)))
    assert jnp.allclose(out, ref, atol=2e-2, rtol=2e-2), f"causal path max err {err}"

    # General path: explicit dense target mask + all-ones source mask (same semantics).
    src_mask = jnp.ones((N, S, S), jnp.float32)
    out_dense = decoder_block(x, value, key_t, src_mask, trg_mask, params,
                              heads=HEADS, trg_causal=False)
    out_dense = jax.block_until_ready(out_dense)
    err_d = float(jnp.max(jnp.abs(out_dense - ref)))
    assert jnp.allclose(out_dense, ref, atol=2e-2, rtol=2e-2), \
        f"dense path max err {err_d}"

    print("KERNEL_OK")
</pallas_src>

<mosaic_0001>
module attributes {stable_mosaic.version = 11 : i64} {
  func.func @_kv_proj_kernel(%arg0: i32, %arg1: memref<1024x128xf32, #tpu.memory_space<vmem>>, %arg2: memref<1024x128xf32, #tpu.memory_space<vmem>>, %arg3: memref<128x128xbf16, #tpu.memory_space<vmem>>, %arg4: memref<128x128xbf16, #tpu.memory_space<vmem>>, %arg5: memref<1024x128xbf16, #tpu.memory_space<vmem>>, %arg6: memref<1024x128xbf16, #tpu.memory_space<vmem>>) attributes {dimension_semantics = [#tpu.dimension_semantics<parallel>], iteration_bounds = array<i64: 2>, scalar_prefetch = 0 : i64, scratch_operands = 0 : i64, tpu.core_type = #tpu.core_type<tc>, window_params = [{transform_indices = @transform_0, window_bounds = array<i64: 1024, 128>}, {transform_indices = @transform_1, window_bounds = array<i64: 1024, 128>}, {pipeline_mode = #tpu.pipeline_mode<synchronous>, transform_indices = @transform_2, window_bounds = array<i64: 128, 128>}, {pipeline_mode = #tpu.pipeline_mode<synchronous>, transform_indices = @transform_3, window_bounds = array<i64: 128, 128>}, {transform_indices = @transform_4, window_bounds = array<i64: 1024, 128>}, {transform_indices = @transform_5, window_bounds = array<i64: 1024, 128>}]} {
    %c0 = arith.constant 0 : index
    %c0_0 = arith.constant 0 : index
    %0 = vector.load %arg1[%c0, %c0_0] : memref<1024x128xf32, #tpu.memory_space<vmem>>, vector<1024x128xf32>
    %1 = arith.truncf %0 : vector<1024x128xf32> to vector<1024x128xbf16>
    %c0_1 = arith.constant 0 : index
    %c0_2 = arith.constant 0 : index
    %2 = vector.load %arg3[%c0_1, %c0_2] : memref<128x128xbf16, #tpu.memory_space<vmem>>, vector<128x128xbf16>
    %cst = arith.constant dense<0.000000e+00> : vector<1024x128xf32>
    %3 = tpu.matmul %1, %2, %cst {dimension_numbers = #tpu.dot_dimension_numbers<[1], [0], [0], [1], [0, 0, 1, 1], [], []>} : vector<1024x128xbf16>, vector<128x128xbf16>, vector<1024x128xf32> -> vector<1024x128xf32>
    %4 = arith.truncf %3 : vector<1024x128xf32> to vector<1024x128xbf16>
    %c0_3 = arith.constant 0 : index
    %c0_4 = arith.constant 0 : index
    %5 = vector.load %arg5[%c0_3, %c0_4] : memref<1024x128xbf16, #tpu.memory_space<vmem>>, vector<1024x128xbf16>
    tpu.vector_store %arg5[%c0_3, %c0_4], %4 {strides = array<i32>} : memref<1024x128xbf16, #tpu.memory_space<vmem>>, vector<1024x128xbf16>,
    %c0_5 = arith.constant 0 : index
    %c0_6 = arith.constant 0 : index
    %6 = vector.load %arg2[%c0_5, %c0_6] : memref<1024x128xf32, #tpu.memory_space<vmem>>, vector<1024x128xf32>
    %7 = arith.truncf %6 : vector<1024x128xf32> to vector<1024x128xbf16>
    %c0_7 = arith.constant 0 : index
    %c0_8 = arith.constant 0 : index
    %8 = vector.load %arg4[%c0_7, %c0_8] : memref<128x128xbf16, #tpu.memory_space<vmem>>, vector<128x128xbf16>
    %cst_9 = arith.constant dense<0.000000e+00> : vector<1024x128xf32>
    %9 = tpu.matmul %7, %8, %cst_9 {dimension_numbers = #tpu.dot_dimension_numbers<[1], [0], [0], [1], [0, 0, 1, 1], [], []>} : vector<1024x128xbf16>, vector<128x128xbf16>, vector<1024x128xf32> -> vector<1024x128xf32>
    %10 = arith.truncf %9 : vector<1024x128xf32> to vector<1024x128xbf16>
    %c0_10 = arith.constant 0 : index
    %c0_11 = arith.constant 0 : index
    %11 = vector.load %arg6[%c0_10, %c0_11] : memref<1024x128xbf16, #tpu.memory_space<vmem>>, vector<1024x128xbf16>
    tpu.vector_store %arg6[%c0_10, %c0_11], %10 {strides = array<i32>} : memref<1024x128xbf16, #tpu.memory_space<vmem>>, vector<1024x128xbf16>,
    return
  }
  func.func @transform_0(%arg0: i32) -> (i32, i32) {
    %c0_i32 = arith.constant 0 : i32
    %c0_i32_0 = arith.constant 0 : i32
    return %arg0, %c0_i32 : i32, i32
  }
  func.func @transform_1(%arg0: i32) -> (i32, i32) {
    %c0_i32 = arith.constant 0 : i32
    %c0_i32_0 = arith.constant 0 : i32
    return %arg0, %c0_i32 : i32, i32
  }
  func.func @transform_2(%arg0: i32) -> (i32, i32) {
    %c0_i32 = arith.constant 0 : i32
    %c0_i32_0 = arith.constant 0 : i32
    %c0_i32_1 = arith.constant 0 : i32
    return %c0_i32, %c0_i32_0 : i32, i32
  }
  func.func @transform_3(%arg0: i32) -> (i32, i32) {
    %c0_i32 = arith.constant 0 : i32
    %c0_i32_0 = arith.constant 0 : i32
    %c0_i32_1 = arith.constant 0 : i32
    return %c0_i32, %c0_i32_0 : i32, i32
  }
  func.func @transform_4(%arg0: i32) -> (i32, i32) {
    %c0_i32 = arith.constant 0 : i32
    %c0_i32_0 = arith.constant 0 : i32
    return %arg0, %c0_i32 : i32, i32
  }
  func.func @transform_5(%arg0: i32) -> (i32, i32) {
    %c0_i32 = arith.constant 0 : i32
    %c0_i32_0 = arith.constant 0 : i32
    return %arg0, %c0_i32 : i32, i32
  }
}

</mosaic_0001>

<bundles_post_ra>
// kernel: tpu_custom_call.1
= control target key start
LH: loop header
LB: loop body
LE: loop exit
PB: predicated region body
PF: predicated region fallthrough
CT: control target
= control target key end

     0   :  { %s6181_s0 = inlined_call_operand.hbm [shape: f32[2048,128], index: 0, kind: input, shape index: {}]   ;;  %s6182_s1 = inlined_call_operand.hbm [shape: f32[2048,128], index: 1, kind: input, shape index: {}]   ;;  %s6183_s2 = inlined_call_operand.hbm [shape: bf16[128,128], index: 2, kind: input, shape index: {}]   ;;  %s6184_s3 = inlined_call_operand.hbm [shape: bf16[128,128], index: 3, kind: input, shape index: {}]   ;;  %s6185_s4 = inlined_call_operand.hbm [shape: bf16[2048,128], index: 4, kind: output, shape index: {0}]   ;;  %s6186_s5 = inlined_call_operand.hbm [shape: bf16[2048,128], index: 5, kind: output, shape index: {1}]  }
   0x1   :  { %6190 = sst [smem:[#allocation19_spill]] %s6181_s0 }
   0x2   :  { %6191 = sst [smem:[#allocation20_spill]] %s6183_s2 }
   0x3   :  { %11 = vsyncpa [#allocation3], 0 }
   0x4   :  { %13 = vsyncpa [#allocation3 + $0x1], 0 }
   0x5   :  { %14 = vsyncpa [#allocation6], 0 }
   0x6   :  { %16 = vsyncpa [#allocation6 + $0x1], 0 }
   0x7   :  { %17 = vsyncpa [#allocation9], 0 }
   0x8   :  { %18 = vsyncpa [#allocation4], 0 }
   0x9   :  { %20 = vsyncpa [#allocation4 + $0x1], 0 }
   0xa   :  { %21 = vsyncpa [#allocation12], 0 }
   0xb   :  { %23 = vsyncpa [#allocation12 + $0x1], 0  ;;  %s5505_s18 = smov 0   ;;  %s5507_s19 = smov 0  }
   0xc   :  { %s5509_s20 = smov 0   ;;  %s5511_s21 = smov 0  }
   0xd LB: > { %s5526_s22 = sadd.s32 4294967295, %s5461_s21   ;;  %s3392_s23 = sadd.s32 4294967294, %s5461_s21   ;;  %s5461_s21 = sphi %s5511_s21, %s6212_s21   ;;  %s5457_s20 = sphi %s5509_s20, %s6211_s20   ;;  %s5453_s19 = sphi %s5507_s19, %s6210_s19   ;;  %s5449_s18 = sphi %s5505_s18, %s6209_s18  }
   0xe   : > { %p49_p0 = scmp.ne.s32.totalorder %s5453_s19, %s5449_s18  ;;  %p6187_p1 = scmp.eq.s32.totalorder %s5526_s22, 0 }
   0xf   : > { %p147_p3 = scmp.eq.s32.totalorder %s3392_s23, 1  ;;  %p3393_p5 = scmp.ge.s32.totalorder %s5461_s21, 1 }
  0x10   : > { %p5535_p4 = por %p6187_p1, %p49_p0  ;;  %p180_p7 = scmp.lt.s32.totalorder %s5461_s21, 3 }
  0x11   : > { %p5540_p6 = por %p147_p3, %p49_p0  ;;  %s5463_s27 = smov [#allocation7]  }
  0x12   : > { %s6192_s24 = scalar_select %p5535_p4, 1, 0 }
  0x13   : > { %s6193_s25 = scalar_select %p5540_p6, 1, 0 }
  0x14   : > { %p5545_p8 = pnand %p3393_p5, %p180_p7  ;;  %s192_s28 = sshll.u32 %s5463_s27, 4  ;;  %s193_s28 = int_to_ptr.vmem [resolvable:$true] %s192_s28 }
  0x15   : > { %s5464_s30 = smov [#allocation8]   ;;  %s5258_s7 = scalar_lea.vmem %s193_s28, 1024 }
  0x16   : > { %p5164_p9 = pneg %p5545_p8  ;;  %s205_s6 = sshll.u32 %s5464_s30, 4  ;;  %s206_s6 = int_to_ptr.vmem [resolvable:$true] %s205_s6 }
  0x17   : > { %p5259_p13 = scmp.ne.s32.totalorder %s193_s28, %s5258_s7  ;;  %p5266_p5 = scmp.lt.s32.totalorder %s193_s28, %s193_s28 }
  0x18   : > { %p5554_p11 = pnand %p5164_p9, %p6187_p1  ;;  %p5267_p7 = scmp.lt.s32.totalorder %s5258_s7, %s5258_s7 }
  0x1a   : > { %p5249_p12 = pneg %p5554_p11  ;;  %p5268_p10 = por %p5267_p7, %p5266_p5 }
  0x1c   : > { %p5261_p0 = pnand %p5259_p13, %p5249_p12 }
  0x1e   : > { %p5262_p3 = pneg %p5261_p0 }
  0x20   : > { %p5269_p9 = pnand %p5268_p10, %p5262_p3 }
  0x22   : > { %5272 = shalt.err (!%p5269_p9)
}
  0x23   : > { %s5465_s8 = smov 64   ;;  %s5466_s9 = smov 4  }
  0x24   : > { %s6196_s2 = sld [smem:[#allocation20_spill]]  ;;  %s5284_s12 = scalar_lea.vmem %s206_s6, 1024 }
  0x25   : > { %p5285_p1 = scmp.ne.s32.totalorder %s206_s6, %s5284_s12  ;;  %p5292_p2 = scmp.lt.s32.totalorder %s206_s6, %s206_s6 }
  0x26   : > { %p5293_p6 = scmp.lt.s32.totalorder %s5284_s12, %s5284_s12 }
  0x27   : > { %p5287_p13 = pnand %p5285_p1, %p5249_p12 }
  0x28   : > { %p5294_p5 = por %p5293_p6, %p5292_p2 }
  0x29   : > { %p5288_p0 = pneg %p5287_p13 }
  0x2a   : > { %5167 = dma.hbm_to_vmem [thread:$0]  (!%p5554_p11), %s6196_s2, 1024, %s193_s28, [#allocation6], %s5465_s8, %s5465_s8, %s5466_s9  }
  0x2b   : > { %p5295_p10 = pnand %p5294_p5, %p5288_p0 }
  0x2d   : > { %5298 = shalt.err (!%p5295_p10)
}
  0x2e   : > { %5170 = dma.hbm_to_vmem [thread:$0]  (!%p5554_p11), %s6184_s3, 1024, %s206_s6, [#allocation9], %s5465_s8, %s5465_s8, %s5466_s9  }
  0x2f   : > { %s5577_s15 = sadd.s32 1, %s5461_s21   ;;  %s36_s16 = sadd.s32 1, %s5457_s20 }
  0x30   : > { %s33_s17 = ssub.s32 %s5461_s21, %s5577_s15  ;;  %p43_p1 = scmp.ne.s32.totalorder %s5457_s20, %s5453_s19 }
  0x31   : > { %p34_p2 = scmp.eq.s32.totalorder %s33_s17, 0  ;;  %p44_p6 = scmp.eq.s32.totalorder %s5461_s21, 0 }
  0x32   : > { %p6197_p12 = scmp.eq.s32.totalorder %s5526_s22, 1  ;;  %p5187_p7 = scmp.lt.s32.totalorder %s5461_s21, 2 }
  0x33   : > { %s5593_s27 = scalar_select %p34_p2, %s5457_s20, %s36_s16  }
  0x34   : > { %p5587_p3 = por %p6197_p12, %p43_p1  ;;  %p45_p9 = por %p44_p6, %p43_p1 }
  0x35   : > { %s219_s28 = sand.u32 1, %s5457_s20   ;;  %s3690_s30 = sshll.u32 %s5461_s21, 14 }
  0x36   : > { %s6198_s23 = scalar_select %p5587_p3, 1, 0 }
  0x37   : > { %s5596_s29 = sshll.u32 %s219_s28, 10  ;;  %s6199_s0 = sld [smem:[#allocation19_spill]] }
  0x38   : > { %s223_s9 = scalar_lea.vmem [#allocation2], %s5596_s29  ;;  %p5609_p11 = pnand %p5187_p7, %p45_p9 }
  0x39   : > { %s230_s10 = sshll.u32 %s223_s9, 4  ;;  %s5613_s12 = scalar_lea.sflag [#allocation3], %s219_s28  ;;  %s5607_s10 = int_to_ptr.vmem [resolvable:$true] %s230_s10 }
  0x3a   : > { %p5301_p0 = pneg %p5609_p11 }
  0x3d   : > { %s5604_s8 = scalar_lea.hbm %s6199_s0, %s3690_s30  ;;  %s5304_s17 = scalar_lea.hbm %s6199_s0, 32768 }
  0x3e   : > { %s5299_s13 = scalar_lea.hbm %s5604_s8, 16384  ;;  %p5305_p1 = scmp.lt.s32.totalorder %s5604_s8, %s6199_s0 }
  0x3f   : > { %p5300_p13 = scmp.ne.s32.totalorder %s5604_s8, %s5299_s13  ;;  %p5306_p2 = scmp.lt.s32.totalorder %s5304_s17, %s5299_s13 }
  0x41   : > { %p5302_p5 = pnand %p5301_p0, %p5300_p13  ;;  %p5307_p6 = por %p5306_p2, %p5305_p1 }
  0x43   : > { %p5303_p10 = pneg %p5302_p5 }
  0x45   : > { %p5308_p12 = pnand %p5307_p6, %p5303_p10 }
  0x47   : > { %5311 = shalt.err (!%p5308_p12)
}
  0x48   : > { %s5312_s28 = scalar_lea.vmem %s5607_s10, 16384  ;;  %s5467_s9 = smov [#allocation2]  }
  0x49   : > { %p5313_p7 = scmp.ne.s32.totalorder %s5607_s10, %s5312_s28  ;;  %s5317_s14 = sshll.u32 %s5467_s9, 4  ;;  %s5318_s14 = int_to_ptr.vmem [resolvable:$false] %s5317_s14 }
  0x4a   : > { %s5319_s16 = scalar_lea.vmem %s5318_s14, 32768  ;;  %p5320_p5 = scmp.lt.s32.totalorder %s5607_s10, %s5318_s14 }
  0x4b   : > { %p5315_p9 = pnand %p5313_p7, %p5301_p0  ;;  %p5321_p3 = scmp.lt.s32.totalorder %s5319_s16, %s5312_s28 }
  0x4d   : > { %p5316_p13 = pneg %p5315_p9  ;;  %p5322_p4 = por %p5321_p3, %p5320_p5 }
  0x4f   : > { %p5323_p1 = pnand %p5322_p4, %p5316_p13 }
  0x51   : > { %5326 = shalt.err (!%p5323_p1)
}
  0x52   : > { %s5468_s13 = smov 128   ;;  %s5469_s17 = smov 8  }
  0x53   : > { %5174 = dma.hbm_to_vmem [thread:$0]  (!%p5609_p11), %s5604_s8, 16384, %s5607_s10, %s5613_s12, %s5468_s13, %s5468_s13, %s5469_s17  }
  0x54   : > { %s5648_s28 = scalar_lea.hbm %s6182_s1, %s3690_s30  ;;  %s244_s9 = scalar_lea.vmem [#allocation5], %s5596_s29 }
  0x55   : > { %s251_s14 = sshll.u32 %s244_s9, 4  ;;  %s240_s16 = sand.u32 1, %s5461_s21   ;;  %s5651_s14 = int_to_ptr.vmem [resolvable:$true] %s251_s14 }
  0x56   : > { %s241_s0 = scalar_lea.sflag [#allocation6], %s240_s16  ;;  %s5327_s2 = scalar_lea.hbm %s5648_s28, 16384 }
  0x57   : > { %p5328_p4 = scmp.ne.s32.totalorder %s5648_s28, %s5327_s2  ;;  %s5332_s30 = scalar_lea.hbm %s6182_s1, 32768 }
  0x58   : > { %p5333_p2 = scmp.lt.s32.totalorder %s5648_s28, %s6182_s1  ;;  %p5334_p6 = scmp.lt.s32.totalorder %s5332_s30, %s5327_s2 }
  0x59   : > { %p5330_p3 = pnand %p5328_p4, %p5301_p0 }
  0x5a   : > { %p5335_p12 = por %p5334_p6, %p5333_p2 }
  0x5b   : > { %p5331_p10 = pneg %p5330_p3 }
  0x5d   : > { %p5336_p7 = pnand %p5335_p12, %p5331_p10 }
  0x5f   : > { %5339 = shalt.err (!%p5336_p7)
}
  0x60   : > { %s5340_s29 = scalar_lea.vmem %s5651_s14, 16384  ;;  %s5470_s7 = smov [#allocation5]  }
  0x61   : > { %p5341_p9 = scmp.ne.s32.totalorder %s5651_s14, %s5340_s29  ;;  %s5345_s9 = sshll.u32 %s5470_s7, 4  ;;  %s5346_s9 = int_to_ptr.vmem [resolvable:$false] %s5345_s9 }
  0x62   : > { %s5347_s16 = scalar_lea.vmem %s5346_s9, 32768  ;;  %p5348_p1 = scmp.lt.s32.totalorder %s5651_s14, %s5346_s9 }
  0x63   : > { %p5343_p13 = pnand %p5341_p9, %p5301_p0  ;;  %p5349_p4 = scmp.lt.s32.totalorder %s5347_s16, %s5340_s29 }
  0x65   : > { %p5344_p5 = pneg %p5343_p13  ;;  %p5350_p3 = por %p5349_p4, %p5348_p1 }
  0x67   : > { %p5351_p2 = pnand %p5350_p3, %p5344_p5 }
  0x69   : > { %5354 = shalt.err (!%p5351_p2)
}
  0x6a   : > { %5177 = dma.hbm_to_vmem [thread:$0]  (!%p5609_p11), %s5648_s28, 16384, %s5651_s14, %s241_s0, %s5468_s13, %s5468_s13, %s5469_s17  }
  0x6b   : > { %263 = sbr.rel (%p5545_p8) target bundleno = 641 (0x281), region = 36  ;;  %s5682_s2 = sand.u32 (!%p5545_p8), 1, %s5453_s19  }
  0x6c   : > { %s3404_s8 = sshll.u32 (!%p5545_p8), %s5682_s2, 10  ;;  %s266_s10 = scalar_lea.sflag (!%p5545_p8), [#allocation3], %s5682_s2 }
  0x6d   : > { %s5686_s30 = scalar_lea.vmem (!%p5545_p8), [#allocation2], %s3404_s8  ;;  %p6201_p0 = scmp.ne.s32.totalorder (!%p5545_p8), %s6192_s24, 0 }
  0x70   : > { %5424 = dma.done.wait (%p6201_p0), %s266_s10, 16384  }
  0x71   : > { %5426 = vsyncadd (%p6201_p0), %s266_s10, 4294950912  ;;  %s274_s0 = sand.u32 1, %s5526_s22   ;;  %s5693_s11 = scalar_lea.vmem [#allocation5], %s3404_s8 }
  0x72   : > { %s275_s26 = scalar_lea.sflag [#allocation6], %s274_s0 }
  0x73   : > { %5428 = dma.done.wait (%p6201_p0), %s275_s26, 16384  }
  0x74   : > { %5430 = vsyncadd (%p6201_p0), %s275_s26, 4294950912  ;;  %p6202_p8 = scmp.eq.s32.totalorder %s5526_s22, 0 }
  0x76   : > { %5432 = dma.done.wait (%p6202_p8), [#allocation6], 1024   ;;  %p6203_p11 = pmov %p6202_p8 }
  0x77   : > { %p6204_p10 = pmov %p6202_p8 }
  0x78   : > { %5434 = vsyncadd (%p6203_p11), [#allocation6], 4294966272 }
  0x79   : > { %5436 = dma.done.wait (%p6204_p10), [#allocation9], 1024   ;;  %p6205_p6 = pmov %p6202_p8 }
  0x7a   : > { %v5231_v0 = vld [vmem:[#allocation7 + $0x38] sm:$0xff]   ;;  %v5233_v2 = vld [vmem:[#allocation7 + $0x30] sm:$0xff]   ;;  %v5235_v4 = vld [vmem:[#allocation7 + $0x28] sm:$0xff]   ;;  %s3408_s24 = sshll.u32 %s5682_s2, 9  ;;  %s3948_s28 = sshll.u32 %s5526_s22, 13 }
  0x7b   : > { %5438 = vsyncadd (%p6205_p6), [#allocation9], 4294966272  ;;  %v5232_v1 = vld [vmem:[#allocation8 + $0x38] sm:$0xff]   ;;  %4860 = vmatprep.subr.bf16.mxu0 %v5231_v0  ;;  %v5234_v3 = vld [vmem:[#allocation8 + $0x30] sm:$0xff]   ;;  %s5920_s13 = scalar_lea.vmem [#allocation10], %s3408_s24  ;;  %s5923_s17 = scalar_lea.vmem [#allocation11], %s3408_s24 }
  0x7c   : > { %5004 = vmatprep.subr.bf16.mxu1 %v5232_v1  ;;  %4861 = vmatpush3.bf16.msra.mxu0 %v5231_v0  ;;  %v5236_v5 = vld [vmem:[#allocation8 + $0x28] sm:$0xff]   ;;  %v5237_v6 = vld [vmem:[#allocation7 + $0x20] sm:$0xff]   ;;  %v5239_v8 = vld [vmem:[#allocation7 + $0x18] sm:$0xff]   ;;  %s3229_s14 = sshll.u32 %s5920_s13, 4  ;;  %s6097_s29 = scalar_lea.hbm %s6185_s4, %s3948_s28  ;;  %s6100_s14 = int_to_ptr.vmem [resolvable:$true] %s3229_s14 }
  0x7d   : > { %5005 = vmatpush3.bf16.msra.mxu1 %v5232_v1  ;;  %4862 = vmatprep.subr.bf16.mxu0 %v5233_v2  ;;  %v5238_v7 = vld [vmem:[#allocation8 + $0x20] sm:$0xff]   ;;  %v5240_v9 = vld [vmem:[#allocation8 + $0x18] sm:$0xff]   ;;  %v5241_v10 = vld [vmem:[#allocation7 + $0x10] sm:$0xff]   ;;  %s3245_s7 = sshll.u32 %s5923_s17, 4  ;;  %s6107_s16 = scalar_lea.hbm %s6186_s5, %s3948_s28  ;;  %s6109_s7 = int_to_ptr.vmem [resolvable:$true] %s3245_s7 }
  0x7e   : > { %5006 = vmatprep.subr.bf16.mxu1 %v5234_v3  ;;  %v328_v11 = vld [vmem:[%s5686_s30] sm:$0xff]  ;;  %v329_v12 = vld [vmem:[%s5686_s30 + $0x8] sm:$0xff]  ;;  %v5242_v14 = vld [vmem:[#allocation8 + $0x10] sm:$0xff]   ;;  %s3211_s8 = scalar_lea.sflag [#allocation4], %s5682_s2  ;;  %s5355_s10 = scalar_lea.vmem %s6100_s14, 8192 }
  0x7f   : > { %v1769_v13 = vld [vmem:[%s5693_s11] sm:$0xff]  ;;  %v456_v15 = vpack.c.bf16 %v329_v12, %v328_v11  ;;  %v1770_v16 = vld [vmem:[%s5693_s11 + $0x8] sm:$0xff]  ;;  %v330_v22 = vld [vmem:[%s5686_s30 + $0x10] sm:$0xff]  ;;  %p5356_p12 = scmp.ne.s32.totalorder %s6100_s14, %s5355_s10  ;;  %p6206_p7 = scmp.ne.s32.totalorder %s6198_s23, 0 }
  0x80   : > { %4863 = vmatpush3.bf16.msra.mxu0 %v5233_v2  ;;  %v1897_v17 = vpack.c.bf16 %v1770_v16, %v1769_v13  ;;  %v5243_v18 = vld [vmem:[#allocation7 + $0x8] sm:$0xff]   ;;  %v5245_v20 = vld [vmem:[#allocation7] sm:$0xff]   ;;  %v331_v23 = vld [vmem:[%s5686_s30 + $0x18] sm:$0xff] }
  0x81   : > { %5007 = vmatpush3.bf16.msra.mxu1 %v5234_v3  ;;  %4864 = vmatprep.subr.bf16.mxu0 %v5235_v4  ;;  %v5244_v19 = vld [vmem:[#allocation8 + $0x8] sm:$0xff]   ;;  %v5246_v21 = vld [vmem:[#allocation8] sm:$0xff]   ;;  %v1771_v24 = vld [vmem:[%s5693_s11 + $0x10] sm:$0xff]  ;;  %v457_v30 = vpack.c.bf16 %v331_v23, %v330_v22  ;;  %p5357_p9 = pnand %p5356_p12, %p6206_p7 }
  0x82   : > { %5008 = vmatprep.subr.bf16.mxu1 %v5236_v5  ;;  %4876 = vmatprep.mubr.bf16.mxu0 %v456_v15  ;;  %v1772_v25 = vld [vmem:[%s5693_s11 + $0x18] sm:$0xff]  ;;  %v332_v26 = vld [vmem:[%s5686_s30 + $0x20] sm:$0xff]  ;;  %v333_v27 = vld [vmem:[%s5686_s30 + $0x28] sm:$0xff] }
  0x83   : > { %5020 = vmatprep.mubr.bf16.mxu1 %v1897_v17  ;;  %v1773_v28 = vld [vmem:[%s5693_s11 + $0x20] sm:$0xff]  ;;  %v1774_v29 = vld [vmem:[%s5693_s11 + $0x28] sm:$0xff]  ;;  %v1898_v31 = vpack.c.bf16 %v1772_v25, %v1771_v24  ;;  %v458_v32 = vpack.c.bf16 %v333_v27, %v332_v26  ;;  %v334_v34 = vld [vmem:[%s5686_s30 + $0x30] sm:$0xff]  ;;  %p5358_p13 = pneg %p5357_p9 }
  0x84   : > { %4865 = vmatpush3.bf16.msra.mxu0 %v5235_v4  ;;  %v1899_v33 = vpack.c.bf16 %v1774_v29, %v1773_v28  ;;  %v335_v35 = vld [vmem:[%s5686_s30 + $0x38] sm:$0xff]  ;;  %v1775_v36 = vld [vmem:[%s5693_s11 + $0x30] sm:$0xff]  ;;  %v336_v38 = vld [vmem:[%s5686_s30 + $0x40] sm:$0xff] }
  0x85   : > { %5009 = vmatpush3.bf16.msra.mxu1 %v5236_v5  ;;  %4866 = vmatprep.subr.bf16.mxu0 %v5237_v6  ;;  %v1776_v37 = vld [vmem:[%s5693_s11 + $0x38] sm:$0xff]  ;;  %v337_v39 = vld [vmem:[%s5686_s30 + $0x48] sm:$0xff]  ;;  %v1777_v40 = vld [vmem:[%s5693_s11 + $0x40] sm:$0xff]  ;;  %v459_v42 = vpack.c.bf16 %v335_v35, %v334_v34 }
  0x86   : > { %5010 = vmatprep.subr.bf16.mxu1 %v5238_v7  ;;  %v1778_v41 = vld [vmem:[%s5693_s11 + $0x48] sm:$0xff]  ;;  %v1900_v43 = vpack.c.bf16 %v1776_v37, %v1775_v36  ;;  %v460_v44 = vpack.c.bf16 %v337_v39, %v336_v38  ;;  %v338_v46 = vld [vmem:[%s5686_s30 + $0x50] sm:$0xff]  ;;  %v339_v47 = vld [vmem:[%s5686_s30 + $0x58] sm:$0xff] }
  0x87   : > { %v1901_v45 = vpack.c.bf16 %v1778_v41, %v1777_v40  ;;  %v1779_v48 = vld [vmem:[%s5693_s11 + $0x50] sm:$0xff]  ;;  %v1780_v49 = vld [vmem:[%s5693_s11 + $0x58] sm:$0xff]  ;;  %v340_v50 = vld [vmem:[%s5686_s30 + $0x60] sm:$0xff]  ;;  %v461_v54 = vpack.c.bf16 %v339_v47, %v338_v46 }
  0x88   : > { %4867 = vmatpush3.bf16.msra.mxu0 %v5237_v6  ;;  %v341_v51 = vld [vmem:[%s5686_s30 + $0x68] sm:$0xff]  ;;  %v1781_v52 = vld [vmem:[%s5693_s11 + $0x60] sm:$0xff]  ;;  %v1902_v55 = vpack.c.bf16 %v1780_v49, %v1779_v48  ;;  %v342_v58 = vld [vmem:[%s5686_s30 + $0x70] sm:$0xff] }
  0x89   : > { %5011 = vmatpush3.bf16.msra.mxu1 %v5238_v7  ;;  %4868 = vmatprep.subr.bf16.mxu0 %v5239_v8  ;;  %v1782_v53 = vld [vmem:[%s5693_s11 + $0x68] sm:$0xff]  ;;  %v462_v56 = vpack.c.bf16 %v341_v51, %v340_v50  ;;  %v343_v59 = vld [vmem:[%s5686_s30 + $0x78] sm:$0xff]  ;;  %v1783_v60 = vld [vmem:[%s5693_s11 + $0x70] sm:$0xff] }
  0x8a   : > { %5012 = vmatprep.subr.bf16.mxu1 %v5240_v9  ;;  %v1903_v57 = vpack.c.bf16 %v1782_v53, %v1781_v52  ;;  %v1784_v61 = vld [vmem:[%s5693_s11 + $0x78] sm:$0xff]  ;;  %v344_v62 = vld [vmem:[%s5686_s30 + $0x80] sm:$0xff]  ;;  %v345_v63 = vld [vmem:[%s5686_s30 + $0x88] sm:$0xff]  ;;  %v463_v2 = vpack.c.bf16 %v343_v59, %v342_v58 }
  0x8b   : > { %v1785_v0 = vld [vmem:[%s5693_s11 + $0x80] sm:$0xff]  ;;  %v1786_v1 = vld [vmem:[%s5693_s11 + $0x88] sm:$0xff]  ;;  %v1904_v3 = vpack.c.bf16 %v1784_v61, %v1783_v60  ;;  %v464_v4 = vpack.c.bf16 %v345_v63, %v344_v62  ;;  %v346_v6 = vld [vmem:[%s5686_s30 + $0x90] sm:$0xff] }
  0x8c   : > { %4869 = vmatpush3.bf16.msra.mxu0 %v5239_v8  ;;  %v1905_v5 = vpack.c.bf16 %v1786_v1, %v1785_v0  ;;  %v347_v7 = vld [vmem:[%s5686_s30 + $0x98] sm:$0xff]  ;;  %v1787_v8 = vld [vmem:[%s5693_s11 + $0x90] sm:$0xff]  ;;  %v349_v11 = vld [vmem:[%s5686_s30 + $0xa8] sm:$0xff] }
  0x8d   : > { %5013 = vmatpush3.bf16.msra.mxu1 %v5240_v9  ;;  %4870 = vmatprep.subr.bf16.mxu0 %v5241_v10  ;;  %v1788_v9 = vld [vmem:[%s5693_s11 + $0x98] sm:$0xff]  ;;  %v1789_v12 = vld [vmem:[%s5693_s11 + $0xa0] sm:$0xff]  ;;  %v1790_v13 = vld [vmem:[%s5693_s11 + $0xa8] sm:$0xff] }
  0x8e   : > { %5014 = vmatprep.subr.bf16.mxu1 %v5242_v14  ;;  %v1906_v15 = vpack.c.bf16 %v1788_v9, %v1787_v8  ;;  %v1907_v17 = vpack.c.bf16 %v1790_v13, %v1789_v12  ;;  %v352_v22 = vld [vmem:[%s5686_s30 + $0xc0] sm:$0xff]  ;;  %v353_v23 = vld [vmem:[%s5686_s30 + $0xc8] sm:$0xff] }
  0x8f   : > { %v1793_v24 = vld [vmem:[%s5693_s11 + $0xc0] sm:$0xff]  ;;  %v1794_v25 = vld [vmem:[%s5693_s11 + $0xc8] sm:$0xff]  ;;  %v468_v28 = vpack.c.bf16 %v353_v23, %v352_v22 }
  0x90   : > { %4871 = vmatpush3.bf16.msra.mxu0 %v5241_v10  ;;  %v348_v10 = vld [vmem:[%s5686_s30 + $0xa0] sm:$0xff]  ;;  %v1909_v29 = vpack.c.bf16 %v1794_v25, %v1793_v24  ;;  %v357_v35 = vld [vmem:[%s5686_s30 + $0xe8] sm:$0xff] }
  0x91   : > { %5015 = vmatpush3.bf16.msra.mxu1 %v5242_v14  ;;  %4872 = vmatprep.subr.bf16.mxu0 %v5243_v18  ;;  %v465_v14 = vpack.c.bf16 %v347_v7, %v346_v6  ;;  %v466_v16 = vpack.c.bf16 %v349_v11, %v348_v10  ;;  %v356_v34 = vld [vmem:[%s5686_s30 + $0xe0] sm:$0xff]  ;;  %v1798_v37 = vld [vmem:[%s5693_s11 + $0xe8] sm:$0xff] }
  0x92   : > { %5016 = vmatprep.subr.bf16.mxu1 %v5244_v19  ;;  %v1797_v36 = vld [vmem:[%s5693_s11 + $0xe0] sm:$0xff]  ;;  %v470_v40 = vpack.c.bf16 %v357_v35, %v356_v34  ;;  %v361_v47 = vld [vmem:[%s5686_s30 + $0x108] sm:$0xff] }
  0x93   : > { %v1911_v41 = vpack.c.bf16 %v1798_v37, %v1797_v36  ;;  %v360_v46 = vld [vmem:[%s5686_s30 + $0x100] sm:$0xff]  ;;  %v1802_v49 = vld [vmem:[%s5693_s11 + $0x108] sm:$0xff] }
  0x94   : > { %4873 = vmatpush3.bf16.msra.mxu0 %v5243_v18  ;;  %v350_v18 = vld [vmem:[%s5686_s30 + $0xb0] sm:$0xff]  ;;  %v1801_v48 = vld [vmem:[%s5693_s11 + $0x100] sm:$0xff]  ;;  %v472_v52 = vpack.c.bf16 %v361_v47, %v360_v46  ;;  %v365_v59 = vld [vmem:[%s5686_s30 + $0x128] sm:$0xff] }
  0x95   : > { %5017 = vmatpush3.bf16.msra.mxu1 %v5244_v19  ;;  %4874 = vmatprep.subr.bf16.mxu0 %v5245_v20  ;;  %v351_v19 = vld [vmem:[%s5686_s30 + $0xb8] sm:$0xff]  ;;  %v1913_v53 = vpack.c.bf16 %v1802_v49, %v1801_v48  ;;  %v364_v58 = vld [vmem:[%s5686_s30 + $0x120] sm:$0xff]  ;;  %v1806_v61 = vld [vmem:[%s5693_s11 + $0x128] sm:$0xff] }
  0x96   : > { %5018 = vmatprep.subr.bf16.mxu1 %v5246_v21  ;;  %v467_v26 = vpack.c.bf16 %v351_v19, %v350_v18  ;;  %v1805_v60 = vld [vmem:[%s5693_s11 + $0x120] sm:$0xff]  ;;  %v474_v0 = vpack.c.bf16 %v365_v59, %v364_v58  ;;  %v369_v7 = vld [vmem:[%s5686_s30 + $0x148] sm:$0xff] }
  0x97   : > { %v1915_v1 = vpack.c.bf16 %v1806_v61, %v1805_v60  ;;  %v368_v6 = vld [vmem:[%s5686_s30 + $0x140] sm:$0xff]  ;;  %v1810_v9 = vld [vmem:[%s5693_s11 + $0x148] sm:$0xff] }
  0x98   : > { %4875 = vmatpush3.bf16.msra.mxu0 %v5245_v20  ;;  %v1791_v20 = vld [vmem:[%s5693_s11 + $0xb0] sm:$0xff]  ;;  %v1809_v8 = vld [vmem:[%s5693_s11 + $0x140] sm:$0xff]  ;;  %v476_v12 = vpack.c.bf16 %v369_v7, %v368_v6  ;;  %v373_v19 = vld [vmem:[%s5686_s30 + $0x168] sm:$0xff] }
  0x99   : > { %5019 = vmatpush3.bf16.msra.mxu1 %v5246_v21  ;;  %v1792_v21 = vld [vmem:[%s5693_s11 + $0xb8] sm:$0xff]  ;;  %v1917_v13 = vpack.c.bf16 %v1810_v9, %v1809_v8  ;;  %v372_v18 = vld [vmem:[%s5686_s30 + $0x160] sm:$0xff] }
  0x9a   : > { %v1908_v27 = vpack.c.bf16 %v1792_v21, %v1791_v20  ;;  %v1813_v20 = vld [vmem:[%s5693_s11 + $0x160] sm:$0xff]  ;;  %v1814_v21 = vld [vmem:[%s5693_s11 + $0x168] sm:$0xff]  ;;  %v478_v24 = vpack.c.bf16 %v373_v19, %v372_v18 }
  0x9b   : > { %4877 = vmatmul.mubr.bf16.vlgmr.msra.gmra.mxu0 %v457_v30  ;;  %v354_v30 = vld [vmem:[%s5686_s30 + $0xd0] sm:$0xff]  ;;  %v1919_v25 = vpack.c.bf16 %v1814_v21, %v1813_v20 }
  0x9c   : > { %5021 = vmatmul.mubr.bf16.vlgmr.msra.gmra.mxu1 %v1898_v31  ;;  %4880 = vmatprep.mubr.bf16.mxu0 %v458_v32  ;;  %v355_v31 = vld [vmem:[%s5686_s30 + $0xd8] sm:$0xff]  ;;  %v1795_v32 = vld [vmem:[%s5693_s11 + $0xd0] sm:$0xff] }
  0x9d   : > { %5024 = vmatprep.mubr.bf16.mxu1 %v1899_v33  ;;  %v1796_v33 = vld [vmem:[%s5693_s11 + $0xd8] sm:$0xff]  ;;  %v469_v38 = vpack.c.bf16 %v355_v31, %v354_v30  ;;  %v376_v30 = vld [vmem:[%s5686_s30 + $0x180] sm:$0xff]  ;;  %v377_v31 = vld [vmem:[%s5686_s30 + $0x188] sm:$0xff] }
  0x9e   : > { %v1910_v39 = vpack.c.bf16 %v1796_v33, %v1795_v32  ;;  %v1817_v32 = vld [vmem:[%s5693_s11 + $0x180] sm:$0xff]  ;;  %v1818_v33 = vld [vmem:[%s5693_s11 + $0x188] sm:$0xff]  ;;  %v480_v36 = vpack.c.bf16 %v377_v31, %v376_v30 }
  0x9f   : > { %v1921_v37 = vpack.c.bf16 %v1818_v33, %v1817_v32 }
  0xa3   : > { %4881 = vmatmul.mubr.bf16.gmra.mxu0 %v459_v42  ;;  %v358_v42 = vld [vmem:[%s5686_s30 + $0xf0] sm:$0xff] }
  0xa4   : > { %5025 = vmatmul.mubr.bf16.gmra.mxu1 %v1900_v43  ;;  %4884 = vmatprep.mubr.bf16.mxu0 %v460_v44  ;;  %v359_v43 = vld [vmem:[%s5686_s30 + $0xf8] sm:$0xff]  ;;  %v1799_v44 = vld [vmem:[%s5693_s11 + $0xf0] sm:$0xff] }
  0xa5   : > { %5028 = vmatprep.mubr.bf16.mxu1 %v1901_v45  ;;  %v1800_v45 = vld [vmem:[%s5693_s11 + $0xf8] sm:$0xff]  ;;  %v471_v50 = vpack.c.bf16 %v359_v43, %v358_v42  ;;  %v380_v42 = vld [vmem:[%s5686_s30 + $0x1a0] sm:$0xff]  ;;  %v381_v43 = vld [vmem:[%s5686_s30 + $0x1a8] sm:$0xff] }
  0xa6   : > { %v1912_v51 = vpack.c.bf16 %v1800_v45, %v1799_v44  ;;  %v1821_v44 = vld [vmem:[%s5693_s11 + $0x1a0] sm:$0xff]  ;;  %v1822_v45 = vld [vmem:[%s5693_s11 + $0x1a8] sm:$0xff]  ;;  %v482_v48 = vpack.c.bf16 %v381_v43, %v380_v42 }
  0xa7   : > { %v1923_v49 = vpack.c.bf16 %v1822_v45, %v1821_v44 }
  0xab   : > { %4885 = vmatmul.mubr.bf16.gmra.mxu0 %v461_v54  ;;  %v362_v54 = vld [vmem:[%s5686_s30 + $0x110] sm:$0xff] }
  0xac   : > { %5029 = vmatmul.mubr.bf16.gmra.mxu1 %v1902_v55  ;;  %4888 = vmatprep.mubr.bf16.mxu0 %v462_v56  ;;  %v363_v55 = vld [vmem:[%s5686_s30 + $0x118] sm:$0xff]  ;;  %v1803_v56 = vld [vmem:[%s5693_s11 + $0x110] sm:$0xff] }
  0xad   : > { %5032 = vmatprep.mubr.bf16.mxu1 %v1903_v57  ;;  %v1804_v57 = vld [vmem:[%s5693_s11 + $0x118] sm:$0xff]  ;;  %v473_v62 = vpack.c.bf16 %v363_v55, %v362_v54  ;;  %v384_v54 = vld [vmem:[%s5686_s30 + $0x1c0] sm:$0xff]  ;;  %v385_v55 = vld [vmem:[%s5686_s30 + $0x1c8] sm:$0xff] }
  0xae   : > { %v1914_v63 = vpack.c.bf16 %v1804_v57, %v1803_v56  ;;  %v1825_v56 = vld [vmem:[%s5693_s11 + $0x1c0] sm:$0xff]  ;;  %v1826_v57 = vld [vmem:[%s5693_s11 + $0x1c8] sm:$0xff]  ;;  %v484_v60 = vpack.c.bf16 %v385_v55, %v384_v54 }
  0xaf   : > { %v1925_v61 = vpack.c.bf16 %v1826_v57, %v1825_v56 }
  0xb3   : > { %4889 = vmatmul.mubr.bf16.gmra.mxu0 %v463_v2  ;;  %v366_v2 = vld [vmem:[%s5686_s30 + $0x130] sm:$0xff] }
  0xb4   : > { %5033 = vmatmul.mubr.bf16.gmra.mxu1 %v1904_v3  ;;  %4892 = vmatprep.mubr.bf16.mxu0 %v464_v4  ;;  %v367_v3 = vld [vmem:[%s5686_s30 + $0x138] sm:$0xff]  ;;  %v1807_v4 = vld [vmem:[%s5693_s11 + $0x130] sm:$0xff] }
  0xb5   : > { %5036 = vmatprep.mubr.bf16.mxu1 %v1905_v5  ;;  %v1808_v5 = vld [vmem:[%s5693_s11 + $0x138] sm:$0xff]  ;;  %v475_v10 = vpack.c.bf16 %v367_v3, %v366_v2  ;;  %v388_v2 = vld [vmem:[%s5686_s30 + $0x1e0] sm:$0xff]  ;;  %v389_v3 = vld [vmem:[%s5686_s30 + $0x1e8] sm:$0xff] }
  0xb6   : > { %v1916_v11 = vpack.c.bf16 %v1808_v5, %v1807_v4  ;;  %v1829_v4 = vld [vmem:[%s5693_s11 + $0x1e0] sm:$0xff]  ;;  %v1830_v5 = vld [vmem:[%s5693_s11 + $0x1e8] sm:$0xff]  ;;  %v486_v8 = vpack.c.bf16 %v389_v3, %v388_v2 }
  0xb7   : > { %v1927_v9 = vpack.c.bf16 %v1830_v5, %v1829_v4 }
  0xbb   : > { %4893 = vmatmul.mubr.bf16.gmra.mxu0 %v465_v14  ;;  %v370_v14 = vld [vmem:[%s5686_s30 + $0x150] sm:$0xff] }
  0xbc   : > { %5037 = vmatmul.mubr.bf16.gmra.mxu1 %v1906_v15  ;;  %4896 = vmatprep.mubr.bf16.mxu0 %v466_v16  ;;  %v371_v15 = vld [vmem:[%s5686_s30 + $0x158] sm:$0xff]  ;;  %v1811_v16 = vld [vmem:[%s5693_s11 + $0x150] sm:$0xff] }
  0xbd   : > { %5040 = vmatprep.mubr.bf16.mxu1 %v1907_v17  ;;  %v1812_v17 = vld [vmem:[%s5693_s11 + $0x158] sm:$0xff]  ;;  %v477_v22 = vpack.c.bf16 %v371_v15, %v370_v14  ;;  %v392_v14 = vld [vmem:[%s5686_s30 + $0x200] sm:$0xff]  ;;  %v393_v15 = vld [vmem:[%s5686_s30 + $0x208] sm:$0xff] }
  0xbe   : > { %v1918_v23 = vpack.c.bf16 %v1812_v17, %v1811_v16  ;;  %v1833_v16 = vld [vmem:[%s5693_s11 + $0x200] sm:$0xff]  ;;  %v1834_v17 = vld [vmem:[%s5693_s11 + $0x208] sm:$0xff]  ;;  %v488_v20 = vpack.c.bf16 %v393_v15, %v392_v14 }
  0xbf   : > { %v1929_v21 = vpack.c.bf16 %v1834_v17, %v1833_v16 }
  0xc3   : > { %4897 = vmatmul.mubr.bf16.gmra.mxu0 %v467_v26  ;;  %v374_v26 = vld [vmem:[%s5686_s30 + $0x170] sm:$0xff] }
  0xc4   : > { %5041 = vmatmul.mubr.bf16.gmra.mxu1 %v1908_v27  ;;  %4900 = vmatprep.mubr.bf16.mxu0 %v468_v28  ;;  %v375_v27 = vld [vmem:[%s5686_s30 + $0x178] sm:$0xff]  ;;  %v1815_v28 = vld [vmem:[%s5693_s11 + $0x170] sm:$0xff] }
  0xc5   : > { %5044 = vmatprep.mubr.bf16.mxu1 %v1909_v29  ;;  %v1816_v29 = vld [vmem:[%s5693_s11 + $0x178] sm:$0xff]  ;;  %v479_v34 = vpack.c.bf16 %v375_v27, %v374_v26  ;;  %v396_v26 = vld [vmem:[%s5686_s30 + $0x220] sm:$0xff]  ;;  %v397_v27 = vld [vmem:[%s5686_s30 + $0x228] sm:$0xff] }
  0xc6   : > { %v1920_v35 = vpack.c.bf16 %v1816_v29, %v1815_v28  ;;  %v1837_v28 = vld [vmem:[%s5693_s11 + $0x220] sm:$0xff]  ;;  %v1838_v29 = vld [vmem:[%s5693_s11 + $0x228] sm:$0xff]  ;;  %v490_v32 = vpack.c.bf16 %v397_v27, %v396_v26 }
  0xc7   : > { %v1931_v33 = vpack.c.bf16 %v1838_v29, %v1837_v28 }
  0xcb   : > { %4901 = vmatmul.mubr.bf16.gmra.mxu0 %v469_v38  ;;  %v378_v38 = vld [vmem:[%s5686_s30 + $0x190] sm:$0xff] }
  0xcc   : > { %5045 = vmatmul.mubr.bf16.gmra.mxu1 %v1910_v39  ;;  %4904 = vmatprep.mubr.bf16.mxu0 %v470_v40  ;;  %v379_v39 = vld [vmem:[%s5686_s30 + $0x198] sm:$0xff]  ;;  %v1819_v40 = vld [vmem:[%s5693_s11 + $0x190] sm:$0xff] }
  0xcd   : > { %5048 = vmatprep.mubr.bf16.mxu1 %v1911_v41  ;;  %v1820_v41 = vld [vmem:[%s5693_s11 + $0x198] sm:$0xff]  ;;  %v481_v46 = vpack.c.bf16 %v379_v39, %v378_v38  ;;  %v400_v38 = vld [vmem:[%s5686_s30 + $0x240] sm:$0xff]  ;;  %v401_v39 = vld [vmem:[%s5686_s30 + $0x248] sm:$0xff] }
  0xce   : > { %v1922_v47 = vpack.c.bf16 %v1820_v41, %v1819_v40  ;;  %v1841_v40 = vld [vmem:[%s5693_s11 + $0x240] sm:$0xff]  ;;  %v1842_v41 = vld [vmem:[%s5693_s11 + $0x248] sm:$0xff]  ;;  %v492_v44 = vpack.c.bf16 %v401_v39, %v400_v38 }
  0xcf   : > { %v1933_v45 = vpack.c.bf16 %v1842_v41, %v1841_v40 }
  0xd3   : > { %4905 = vmatmul.mubr.bf16.gmra.mxu0 %v471_v50  ;;  %v382_v50 = vld [vmem:[%s5686_s30 + $0x1b0] sm:$0xff] }
  0xd4   : > { %5049 = vmatmul.mubr.bf16.gmra.mxu1 %v1912_v51  ;;  %4908 = vmatprep.mubr.bf16.mxu0 %v472_v52  ;;  %v383_v51 = vld [vmem:[%s5686_s30 + $0x1b8] sm:$0xff]  ;;  %v1823_v52 = vld [vmem:[%s5693_s11 + $0x1b0] sm:$0xff] }
  0xd5   : > { %5052 = vmatprep.mubr.bf16.mxu1 %v1913_v53  ;;  %v1824_v53 = vld [vmem:[%s5693_s11 + $0x1b8] sm:$0xff]  ;;  %v483_v58 = vpack.c.bf16 %v383_v51, %v382_v50  ;;  %v404_v50 = vld [vmem:[%s5686_s30 + $0x260] sm:$0xff]  ;;  %v405_v51 = vld [vmem:[%s5686_s30 + $0x268] sm:$0xff] }
  0xd6   : > { %v1924_v59 = vpack.c.bf16 %v1824_v53, %v1823_v52  ;;  %v1845_v52 = vld [vmem:[%s5693_s11 + $0x260] sm:$0xff]  ;;  %v1846_v53 = vld [vmem:[%s5693_s11 + $0x268] sm:$0xff]  ;;  %v494_v56 = vpack.c.bf16 %v405_v51, %v404_v50 }
  0xd7   : > { %v1935_v57 = vpack.c.bf16 %v1846_v53, %v1845_v52 }
  0xdb   : > { %4909 = vmatmul.mubr.bf16.gmra.mxu0 %v473_v62  ;;  %v386_v62 = vld [vmem:[%s5686_s30 + $0x1d0] sm:$0xff] }
  0xdc   : > { %5053 = vmatmul.mubr.bf16.gmra.mxu1 %v1914_v63  ;;  %4912 = vmatprep.mubr.bf16.mxu0 %v474_v0  ;;  %v387_v63 = vld [vmem:[%s5686_s30 + $0x1d8] sm:$0xff]  ;;  %v1827_v0 = vld [vmem:[%s5693_s11 + $0x1d0] sm:$0xff] }
  0xdd   : > { %5056 = vmatprep.mubr.bf16.mxu1 %v1915_v1  ;;  %v1828_v1 = vld [vmem:[%s5693_s11 + $0x1d8] sm:$0xff]  ;;  %v485_v6 = vpack.c.bf16 %v387_v63, %v386_v62  ;;  %v408_v62 = vld [vmem:[%s5686_s30 + $0x280] sm:$0xff]  ;;  %v409_v63 = vld [vmem:[%s5686_s30 + $0x288] sm:$0xff] }
  0xde   : > { %v1926_v7 = vpack.c.bf16 %v1828_v1, %v1827_v0  ;;  %v1849_v0 = vld [vmem:[%s5693_s11 + $0x280] sm:$0xff]  ;;  %v1850_v1 = vld [vmem:[%s5693_s11 + $0x288] sm:$0xff]  ;;  %v496_v4 = vpack.c.bf16 %v409_v63, %v408_v62 }
  0xdf   : > { %v1937_v5 = vpack.c.bf16 %v1850_v1, %v1849_v0 }
  0xe3   : > { %4913 = vmatmul.mubr.bf16.gmra.mxu0 %v475_v10  ;;  %v390_v10 = vld [vmem:[%s5686_s30 + $0x1f0] sm:$0xff] }
  0xe4   : > { %5057 = vmatmul.mubr.bf16.gmra.mxu1 %v1916_v11  ;;  %4916 = vmatprep.mubr.bf16.mxu0 %v476_v12  ;;  %v391_v11 = vld [vmem:[%s5686_s30 + $0x1f8] sm:$0xff]  ;;  %v1831_v12 = vld [vmem:[%s5693_s11 + $0x1f0] sm:$0xff] }
  0xe5   : > { %5060 = vmatprep.mubr.bf16.mxu1 %v1917_v13  ;;  %v1832_v13 = vld [vmem:[%s5693_s11 + $0x1f8] sm:$0xff]  ;;  %v487_v18 = vpack.c.bf16 %v391_v11, %v390_v10  ;;  %v412_v10 = vld [vmem:[%s5686_s30 + $0x2a0] sm:$0xff]  ;;  %v413_v11 = vld [vmem:[%s5686_s30 + $0x2a8] sm:$0xff] }
  0xe6   : > { %v1928_v19 = vpack.c.bf16 %v1832_v13, %v1831_v12  ;;  %v1853_v12 = vld [vmem:[%s5693_s11 + $0x2a0] sm:$0xff]  ;;  %v1854_v13 = vld [vmem:[%s5693_s11 + $0x2a8] sm:$0xff]  ;;  %v498_v16 = vpack.c.bf16 %v413_v11, %v412_v10 }
  0xe7   : > { %v1939_v17 = vpack.c.bf16 %v1854_v13, %v1853_v12  ;;  %v433_v10 = vld [vmem:[%s5686_s30 + $0x348] sm:$0xff]  ;;  %v1873_v12 = vld [vmem:[%s5693_s11 + $0x340] sm:$0xff] }
  0xe8   : > { %v1874_v13 = vld [vmem:[%s5693_s11 + $0x348] sm:$0xff] }
  0xeb   : > { %4917 = vmatmul.mubr.bf16.gmra.mxu0 %v477_v22  ;;  %v394_v22 = vld [vmem:[%s5686_s30 + $0x210] sm:$0xff] }
  0xec   : > { %5061 = vmatmul.mubr.bf16.gmra.mxu1 %v1918_v23  ;;  %4920 = vmatprep.mubr.bf16.mxu0 %v478_v24  ;;  %v395_v23 = vld [vmem:[%s5686_s30 + $0x218] sm:$0xff]  ;;  %v1835_v24 = vld [vmem:[%s5693_s11 + $0x210] sm:$0xff] }
  0xed   : > { %5064 = vmatprep.mubr.bf16.mxu1 %v1919_v25  ;;  %v1836_v25 = vld [vmem:[%s5693_s11 + $0x218] sm:$0xff]  ;;  %v489_v30 = vpack.c.bf16 %v395_v23, %v394_v22  ;;  %v416_v22 = vld [vmem:[%s5686_s30 + $0x2c0] sm:$0xff]  ;;  %v417_v23 = vld [vmem:[%s5686_s30 + $0x2c8] sm:$0xff] }
  0xee   : > { %v1930_v31 = vpack.c.bf16 %v1836_v25, %v1835_v24  ;;  %v1857_v24 = vld [vmem:[%s5693_s11 + $0x2c0] sm:$0xff]  ;;  %v1858_v25 = vld [vmem:[%s5693_s11 + $0x2c8] sm:$0xff]  ;;  %v500_v28 = vpack.c.bf16 %v417_v23, %v416_v22  ;;  %v1949_v22 = vpack.c.bf16 %v1874_v13, %v1873_v12  ;;  %v442_v12 = vld [vmem:[%s5686_s30 + $0x390] sm:$0xff] }
  0xef   : > { %v1941_v29 = vpack.c.bf16 %v1858_v25, %v1857_v24  ;;  %v443_v13 = vld [vmem:[%s5686_s30 + $0x398] sm:$0xff] }
  0xf3   : > { %4921 = vmatmul.mubr.bf16.gmra.mxu0 %v479_v34  ;;  %v398_v34 = vld [vmem:[%s5686_s30 + $0x230] sm:$0xff] }
  0xf4   : > { %5065 = vmatmul.mubr.bf16.gmra.mxu1 %v1920_v35  ;;  %4924 = vmatprep.mubr.bf16.mxu0 %v480_v36  ;;  %v399_v35 = vld [vmem:[%s5686_s30 + $0x238] sm:$0xff]  ;;  %v1839_v36 = vld [vmem:[%s5693_s11 + $0x230] sm:$0xff] }
  0xf5   : > { %5068 = vmatprep.mubr.bf16.mxu1 %v1921_v37  ;;  %v1840_v37 = vld [vmem:[%s5693_s11 + $0x238] sm:$0xff]  ;;  %v491_v42 = vpack.c.bf16 %v399_v35, %v398_v34  ;;  %v420_v34 = vld [vmem:[%s5686_s30 + $0x2e0] sm:$0xff]  ;;  %v421_v35 = vld [vmem:[%s5686_s30 + $0x2e8] sm:$0xff] }
  0xf6   : > { %v1932_v43 = vpack.c.bf16 %v1840_v37, %v1839_v36  ;;  %v1861_v36 = vld [vmem:[%s5693_s11 + $0x2e0] sm:$0xff]  ;;  %v1862_v37 = vld [vmem:[%s5693_s11 + $0x2e8] sm:$0xff]  ;;  %v502_v40 = vpack.c.bf16 %v421_v35, %v420_v34 }
  0xf7   : > { %v1943_v41 = vpack.c.bf16 %v1862_v37, %v1861_v36  ;;  %v437_v34 = vld [vmem:[%s5686_s30 + $0x368] sm:$0xff]  ;;  %v1877_v36 = vld [vmem:[%s5693_s11 + $0x360] sm:$0xff] }
  0xf8   : > { %v1878_v37 = vld [vmem:[%s5693_s11 + $0x368] sm:$0xff] }
  0xfb   : > { %4925 = vmatmul.mubr.bf16.gmra.mxu0 %v481_v46  ;;  %v402_v46 = vld [vmem:[%s5686_s30 + $0x250] sm:$0xff] }
  0xfc   : > { %5069 = vmatmul.mubr.bf16.gmra.mxu1 %v1922_v47  ;;  %4928 = vmatprep.mubr.bf16.mxu0 %v482_v48  ;;  %v403_v47 = vld [vmem:[%s5686_s30 + $0x258] sm:$0xff]  ;;  %v1843_v48 = vld [vmem:[%s5693_s11 + $0x250] sm:$0xff] }
  0xfd   : > { %5072 = vmatprep.mubr.bf16.mxu1 %v1923_v49  ;;  %v1844_v49 = vld [vmem:[%s5693_s11 + $0x258] sm:$0xff]  ;;  %v493_v54 = vpack.c.bf16 %v403_v47, %v402_v46  ;;  %v424_v46 = vld [vmem:[%s5686_s30 + $0x300] sm:$0xff]  ;;  %v425_v47 = vld [vmem:[%s5686_s30 + $0x308] sm:$0xff] }
  0xfe   : > { %v1934_v55 = vpack.c.bf16 %v1844_v49, %v1843_v48  ;;  %v1865_v48 = vld [vmem:[%s5693_s11 + $0x300] sm:$0xff]  ;;  %v1866_v49 = vld [vmem:[%s5693_s11 + $0x308] sm:$0xff]  ;;  %v504_v52 = vpack.c.bf16 %v425_v47, %v424_v46  ;;  %v1951_v46 = vpack.c.bf16 %v1878_v37, %v1877_v36  ;;  %v446_v36 = vld [vmem:[%s5686_s30 + $0x3b0] sm:$0xff] }
  0xff   : > { %v1945_v53 = vpack.c.bf16 %v1866_v49, %v1865_v48  ;;  %v447_v37 = vld [vmem:[%s5686_s30 + $0x3b8] sm:$0xff] }
 0x103   : > { %4929 = vmatmul.mubr.bf16.gmra.mxu0 %v483_v58  ;;  %v406_v58 = vld [vmem:[%s5686_s30 + $0x270] sm:$0xff] }
 0x104   : > { %5073 = vmatmul.mubr.bf16.gmra.mxu1 %v1924_v59  ;;  %4932 = vmatprep.mubr.bf16.mxu0 %v484_v60  ;;  %v407_v59 = vld [vmem:[%s5686_s30 + $0x278] sm:$0xff]  ;;  %v1847_v60 = vld [vmem:[%s5693_s11 + $0x270] sm:$0xff] }
 0x105   : > { %5076 = vmatprep.mubr.bf16.mxu1 %v1925_v61  ;;  %v1848_v61 = vld [vmem:[%s5693_s11 + $0x278] sm:$0xff]  ;;  %v495_v2 = vpack.c.bf16 %v407_v59, %v406_v58  ;;  %v428_v58 = vld [vmem:[%s5686_s30 + $0x320] sm:$0xff]  ;;  %v429_v59 = vld [vmem:[%s5686_s30 + $0x328] sm:$0xff] }
 0x106   : > { %v1936_v3 = vpack.c.bf16 %v1848_v61, %v1847_v60  ;;  %v1869_v60 = vld [vmem:[%s5693_s11 + $0x320] sm:$0xff]  ;;  %v1870_v61 = vld [vmem:[%s5693_s11 + $0x328] sm:$0xff]  ;;  %v506_v0 = vpack.c.bf16 %v429_v59, %v428_v58 }
 0x107   : > { %v1947_v1 = vpack.c.bf16 %v1870_v61, %v1869_v60  ;;  %v441_v58 = vld [vmem:[%s5686_s30 + $0x388] sm:$0xff]  ;;  %v1881_v60 = vld [vmem:[%s5693_s11 + $0x380] sm:$0xff] }
 0x108   : > { %v1882_v61 = vld [vmem:[%s5693_s11 + $0x388] sm:$0xff] }
 0x10b   : > { %4933 = vmatmul.mubr.bf16.gmra.mxu0 %v485_v6  ;;  %v410_v6 = vld [vmem:[%s5686_s30 + $0x290] sm:$0xff] }
 0x10c   : > { %5077 = vmatmul.mubr.bf16.gmra.mxu1 %v1926_v7  ;;  %4936 = vmatprep.mubr.bf16.mxu0 %v486_v8  ;;  %v411_v7 = vld [vmem:[%s5686_s30 + $0x298] sm:$0xff]  ;;  %v1851_v8 = vld [vmem:[%s5693_s11 + $0x290] sm:$0xff] }
 0x10d   : > { %5080 = vmatprep.mubr.bf16.mxu1 %v1927_v9  ;;  %v1852_v9 = vld [vmem:[%s5693_s11 + $0x298] sm:$0xff]  ;;  %v497_v14 = vpack.c.bf16 %v411_v7, %v410_v6  ;;  %v1871_v6 = vld [vmem:[%s5693_s11 + $0x330] sm:$0xff] }
 0x10e   : > { %v1938_v15 = vpack.c.bf16 %v1852_v9, %v1851_v8  ;;  %v1872_v8 = vld [vmem:[%s5693_s11 + $0x338] sm:$0xff]  ;;  %v432_v9 = vld [vmem:[%s5686_s30 + $0x340] sm:$0xff] }
 0x113   : > { %4937 = vmatmul.mubr.bf16.gmra.mxu0 %v487_v18  ;;  %v414_v18 = vld [vmem:[%s5686_s30 + $0x2b0] sm:$0xff] }
 0x114   : > { %5081 = vmatmul.mubr.bf16.gmra.mxu1 %v1928_v19  ;;  %4940 = vmatprep.mubr.bf16.mxu0 %v488_v20  ;;  %v415_v19 = vld [vmem:[%s5686_s30 + $0x2b8] sm:$0xff]  ;;  %v1855_v20 = vld [vmem:[%s5693_s11 + $0x2b0] sm:$0xff] }
 0x115   : > { %5084 = vmatprep.mubr.bf16.mxu1 %v1929_v21  ;;  %v1856_v21 = vld [vmem:[%s5693_s11 + $0x2b8] sm:$0xff]  ;;  %v499_v26 = vpack.c.bf16 %v415_v19, %v414_v18  ;;  %v1948_v18 = vpack.c.bf16 %v1872_v8, %v1871_v6  ;;  %v508_v19 = vpack.c.bf16 %v433_v10, %v432_v9  ;;  %v1953_v6 = vpack.c.bf16 %v1882_v61, %v1881_v60  ;;  %v450_v60 = vld [vmem:[%s5686_s30 + $0x3d0] sm:$0xff] }
 0x116   : > { %v1940_v27 = vpack.c.bf16 %v1856_v21, %v1855_v20  ;;  %v451_v61 = vld [vmem:[%s5686_s30 + $0x3d8] sm:$0xff] }
 0x11b   : > { %4941 = vmatmul.mubr.bf16.gmra.mxu0 %v489_v30  ;;  %v418_v30 = vld [vmem:[%s5686_s30 + $0x2d0] sm:$0xff] }
 0x11c   : > { %5085 = vmatmul.mubr.bf16.gmra.mxu1 %v1930_v31  ;;  %4944 = vmatprep.mubr.bf16.mxu0 %v490_v32  ;;  %v419_v31 = vld [vmem:[%s5686_s30 + $0x2d8] sm:$0xff]  ;;  %v1859_v32 = vld [vmem:[%s5693_s11 + $0x2d0] sm:$0xff] }
 0x11d   : > { %5088 = vmatprep.mubr.bf16.mxu1 %v1931_v33  ;;  %v1860_v33 = vld [vmem:[%s5693_s11 + $0x2d8] sm:$0xff]  ;;  %v501_v38 = vpack.c.bf16 %v419_v31, %v418_v30  ;;  %v1875_v30 = vld [vmem:[%s5693_s11 + $0x350] sm:$0xff] }
 0x11e   : > { %v1942_v39 = vpack.c.bf16 %v1860_v33, %v1859_v32  ;;  %v1876_v32 = vld [vmem:[%s5693_s11 + $0x358] sm:$0xff]  ;;  %v436_v33 = vld [vmem:[%s5686_s30 + $0x360] sm:$0xff] }
 0x123   : > { %4945 = vmatmul.mubr.bf16.gmra.mxu0 %v491_v42  ;;  %v422_v42 = vld [vmem:[%s5686_s30 + $0x2f0] sm:$0xff] }
 0x124   : > { %5089 = vmatmul.mubr.bf16.gmra.mxu1 %v1932_v43  ;;  %4948 = vmatprep.mubr.bf16.mxu0 %v492_v44  ;;  %v423_v43 = vld [vmem:[%s5686_s30 + $0x2f8] sm:$0xff]  ;;  %v1863_v44 = vld [vmem:[%s5693_s11 + $0x2f0] sm:$0xff] }
 0x125   : > { %5092 = vmatprep.mubr.bf16.mxu1 %v1933_v45  ;;  %v1864_v45 = vld [vmem:[%s5693_s11 + $0x2f8] sm:$0xff]  ;;  %v503_v50 = vpack.c.bf16 %v423_v43, %v422_v42  ;;  %v1950_v42 = vpack.c.bf16 %v1876_v32, %v1875_v30  ;;  %v510_v43 = vpack.c.bf16 %v437_v34, %v436_v33 }
 0x126   : > { %v1944_v51 = vpack.c.bf16 %v1864_v45, %v1863_v44 }
 0x12b   : > { %4949 = vmatmul.mubr.bf16.gmra.mxu0 %v493_v54  ;;  %v426_v54 = vld [vmem:[%s5686_s30 + $0x310] sm:$0xff] }
 0x12c   : > { %5093 = vmatmul.mubr.bf16.gmra.mxu1 %v1934_v55  ;;  %4952 = vmatprep.mubr.bf16.mxu0 %v494_v56  ;;  %v427_v55 = vld [vmem:[%s5686_s30 + $0x318] sm:$0xff]  ;;  %v1867_v56 = vld [vmem:[%s5693_s11 + $0x310] sm:$0xff] }
 0x12d   : > { %5096 = vmatprep.mubr.bf16.mxu1 %v1935_v57  ;;  %v1868_v57 = vld [vmem:[%s5693_s11 + $0x318] sm:$0xff]  ;;  %v505_v62 = vpack.c.bf16 %v427_v55, %v426_v54  ;;  %v1879_v54 = vld [vmem:[%s5693_s11 + $0x370] sm:$0xff] }
 0x12e   : > { %v1946_v63 = vpack.c.bf16 %v1868_v57, %v1867_v56  ;;  %v1880_v56 = vld [vmem:[%s5693_s11 + $0x378] sm:$0xff]  ;;  %v440_v57 = vld [vmem:[%s5686_s30 + $0x380] sm:$0xff] }
 0x133   : > { %4953 = vmatmul.mubr.bf16.gmra.mxu0 %v495_v2 }
 0x134   : > { %5097 = vmatmul.mubr.bf16.gmra.mxu1 %v1936_v3  ;;  %4956 = vmatprep.mubr.bf16.mxu0 %v496_v4  ;;  %v430_v4 = vld [vmem:[%s5686_s30 + $0x330] sm:$0xff] }
 0x135   : > { %5100 = vmatprep.mubr.bf16.mxu1 %v1937_v5  ;;  %v431_v5 = vld [vmem:[%s5686_s30 + $0x338] sm:$0xff] }
 0x13b   : > { %4957 = vmatmul.mubr.bf16.gmra.mxu0 %v497_v14 }
 0x13c   : > { %5101 = vmatmul.mubr.bf16.gmra.mxu1 %v1938_v15  ;;  %4960 = vmatprep.mubr.bf16.mxu0 %v498_v16  ;;  %v507_v15 = vpack.c.bf16 %v431_v5, %v430_v4 }
 0x13d   : > { %5104 = vmatprep.mubr.bf16.mxu1 %v1939_v17 }
 0x143   : > { %4961 = vmatmul.mubr.bf16.gmra.mxu0 %v499_v26 }
 0x144   : > { %5105 = vmatmul.mubr.bf16.gmra.mxu1 %v1940_v27  ;;  %4964 = vmatprep.mubr.bf16.mxu0 %v500_v28  ;;  %v434_v28 = vld [vmem:[%s5686_s30 + $0x350] sm:$0xff] }
 0x145   : > { %5108 = vmatprep.mubr.bf16.mxu1 %v1941_v29  ;;  %v435_v29 = vld [vmem:[%s5686_s30 + $0x358] sm:$0xff] }
 0x14b   : > { %4965 = vmatmul.mubr.bf16.gmra.mxu0 %v501_v38 }
 0x14c   : > { %5109 = vmatmul.mubr.bf16.gmra.mxu1 %v1942_v39  ;;  %4968 = vmatprep.mubr.bf16.mxu0 %v502_v40  ;;  %v509_v39 = vpack.c.bf16 %v435_v29, %v434_v28 }
 0x14d   : > { %5112 = vmatprep.mubr.bf16.mxu1 %v1943_v41 }
 0x153   : > { %4969 = vmatmul.mubr.bf16.gmra.mxu0 %v503_v50 }
 0x154   : > { %5113 = vmatmul.mubr.bf16.gmra.mxu1 %v1944_v51  ;;  %4972 = vmatprep.mubr.bf16.mxu0 %v504_v52  ;;  %v438_v52 = vld [vmem:[%s5686_s30 + $0x370] sm:$0xff] }
 0x155   : > { %5116 = vmatprep.mubr.bf16.mxu1 %v1945_v53  ;;  %v439_v53 = vld [vmem:[%s5686_s30 + $0x378] sm:$0xff] }
 0x15b   : > { %v4878_v2 = vpop.f32.mrf.mxu0  ;;  %4973 = vmatmul.mubr.bf16.gmra.mxu0 %v505_v62 }
 0x15c   : > { %v5022_v3 = vpop.f32.mrf.mxu1  ;;  %5117 = vmatmul.mubr.bf16.gmra.mxu1 %v1946_v63  ;;  %4976 = vmatprep.mubr.bf16.mxu0 %v506_v0  ;;  %v511_v63 = vpack.c.bf16 %v439_v53, %v438_v52 }
 0x15d   : > { %v618_v7 = vpop.f32.mrf.mxu0  ;;  %5120 = vmatprep.mubr.bf16.mxu1 %v1947_v1 }
 0x15e   : > { %v2059_v11 = vpop.f32.mrf.mxu1 }
 0x15f   : > { %v4879_v14 = vpop.f32.mrf.mxu0 }
 0x160   : > { %v3958_v16 = vpack.c.bf16 %v4879_v14, %v4878_v2  ;;  %v5023_v17 = vpop.f32.mrf.mxu1  ;;  %v1952_v2 = vpack.c.bf16 %v1880_v56, %v1879_v54  ;;  %v1883_v14 = vld [vmem:[%s5693_s11 + $0x390] sm:$0xff] }
 0x161   : > { %v4278_v20 = vpack.c.bf16 %v5023_v17, %v5022_v3  ;;  %v621_v21 = vpop.f32.mrf.mxu0  ;;  %v512_v3 = vpack.c.bf16 %v441_v58, %v440_v57  ;;  %v444_v17 = vld [vmem:[%s5686_s30 + $0x3a0] sm:$0xff] }
 0x162   : > { %4590 = vst [vmem:[%s5920_s13 + $0x8] sm:$0xff] %v3958_v16   ;;  %v3953_v23 = vpack.c.bf16 %v621_v21, %v618_v7  ;;  %v2062_v24 = vpop.f32.mrf.mxu1  ;;  %v1884_v16 = vld [vmem:[%s5693_s11 + $0x398] sm:$0xff]  ;;  %v1886_v21 = vld [vmem:[%s5693_s11 + $0x3a8] sm:$0xff] }
 0x163   : > { %4653 = vst [vmem:[%s5923_s17 + $0x8] sm:$0xff] %v4278_v20   ;;  %v4273_v25 = vpack.c.bf16 %v2062_v24, %v2059_v11  ;;  %v4882_v26 = vpop.f32.mrf.mxu0  ;;  %4977 = vmatmul.mubr.bf16.gmra.mxu0 %v507_v15  ;;  %v1885_v20 = vld [vmem:[%s5693_s11 + $0x3a0] sm:$0xff] }
 0x164   : > { %3954 = vst [vmem:[%s5920_s13] sm:$0xff] %v3953_v23   ;;  %v5026_v27 = vpop.f32.mrf.mxu1  ;;  %5121 = vmatmul.mubr.bf16.gmra.mxu1 %v1948_v18  ;;  %4980 = vmatprep.mubr.bf16.mxu0 %v508_v19  ;;  %v445_v18 = vld [vmem:[%s5686_s30 + $0x3a8] sm:$0xff]  ;;  %v513_v23 = vpack.c.bf16 %v443_v13, %v442_v12  ;;  %v1955_v30 = vpack.c.bf16 %v1886_v21, %v1885_v20  ;;  %v454_v20 = vld [vmem:[%s5686_s30 + $0x3f0] sm:$0xff]  ;;  %v455_v21 = vld [vmem:[%s5686_s30 + $0x3f8] sm:$0xff] }
 0x165   : > { %4274 = vst [vmem:[%s5923_s17] sm:$0xff] %v4273_v25   ;;  %v634_v31 = vpop.f32.mrf.mxu0  ;;  %5124 = vmatprep.mubr.bf16.mxu1 %v1949_v22 }
 0x166   : > { %v2075_v35 = vpop.f32.mrf.mxu1 }
 0x167   : > { %v4883_v38 = vpop.f32.mrf.mxu0 }
 0x168   : > { %v3968_v40 = vpack.c.bf16 %v4883_v38, %v4882_v26  ;;  %v5027_v41 = vpop.f32.mrf.mxu1  ;;  %v1954_v26 = vpack.c.bf16 %v1884_v16, %v1883_v14  ;;  %v1887_v38 = vld [vmem:[%s5693_s11 + $0x3b0] sm:$0xff] }
 0x169   : > { %v4288_v44 = vpack.c.bf16 %v5027_v41, %v5026_v27  ;;  %v637_v45 = vpop.f32.mrf.mxu0  ;;  %v514_v27 = vpack.c.bf16 %v445_v18, %v444_v17  ;;  %v448_v41 = vld [vmem:[%s5686_s30 + $0x3c0] sm:$0xff] }
 0x16a   : > { %4592 = vst [vmem:[%s5920_s13 + $0x18] sm:$0xff] %v3968_v40   ;;  %v3963_v47 = vpack.c.bf16 %v637_v45, %v634_v31  ;;  %v2078_v48 = vpop.f32.mrf.mxu1  ;;  %v1888_v40 = vld [vmem:[%s5693_s11 + $0x3b8] sm:$0xff]  ;;  %v1890_v45 = vld [vmem:[%s5693_s11 + $0x3c8] sm:$0xff] }
 0x16b   : > { %4655 = vst [vmem:[%s5923_s17 + $0x18] sm:$0xff] %v4288_v44   ;;  %v4283_v49 = vpack.c.bf16 %v2078_v48, %v2075_v35  ;;  %v4886_v50 = vpop.f32.mrf.mxu0  ;;  %4981 = vmatmul.mubr.bf16.gmra.mxu0 %v509_v39  ;;  %v1889_v44 = vld [vmem:[%s5693_s11 + $0x3c0] sm:$0xff] }
 0x16c   : > { %4591 = vst [vmem:[%s5920_s13 + $0x10] sm:$0xff] %v3963_v47   ;;  %v5030_v51 = vpop.f32.mrf.mxu1  ;;  %5125 = vmatmul.mubr.bf16.gmra.mxu1 %v1950_v42  ;;  %4984 = vmatprep.mubr.bf16.mxu0 %v510_v43  ;;  %v449_v42 = vld [vmem:[%s5686_s30 + $0x3c8] sm:$0xff]  ;;  %v515_v47 = vpack.c.bf16 %v447_v37, %v446_v36  ;;  %v1957_v54 = vpack.c.bf16 %v1890_v45, %v1889_v44 }
 0x16d   : > { %4654 = vst [vmem:[%s5923_s17 + $0x10] sm:$0xff] %v4283_v49   ;;  %v650_v55 = vpop.f32.mrf.mxu0  ;;  %5128 = vmatprep.mubr.bf16.mxu1 %v1951_v46 }
 0x16e   : > { %v2091_v59 = vpop.f32.mrf.mxu1 }
 0x16f   : > { %v4887_v62 = vpop.f32.mrf.mxu0 }
 0x170   : > { %v3978_v0 = vpack.c.bf16 %v4887_v62, %v4886_v50  ;;  %v5031_v1 = vpop.f32.mrf.mxu1  ;;  %v1956_v50 = vpack.c.bf16 %v1888_v40, %v1887_v38  ;;  %v1891_v62 = vld [vmem:[%s5693_s11 + $0x3d0] sm:$0xff] }
 0x171   : > { %v4298_v4 = vpack.c.bf16 %v5031_v1, %v5030_v51  ;;  %v653_v5 = vpop.f32.mrf.mxu0  ;;  %v516_v51 = vpack.c.bf16 %v449_v42, %v448_v41  ;;  %v452_v1 = vld [vmem:[%s5686_s30 + $0x3e0] sm:$0xff] }
 0x172   : > { %4594 = vst [vmem:[%s5920_s13 + $0x28] sm:$0xff] %v3978_v0   ;;  %v3973_v7 = vpack.c.bf16 %v653_v5, %v650_v55  ;;  %v2094_v8 = vpop.f32.mrf.mxu1  ;;  %v1892_v0 = vld [vmem:[%s5693_s11 + $0x3d8] sm:$0xff]  ;;  %v1894_v5 = vld [vmem:[%s5693_s11 + $0x3e8] sm:$0xff] }
 0x173   : > { %4657 = vst [vmem:[%s5923_s17 + $0x28] sm:$0xff] %v4298_v4   ;;  %v4293_v9 = vpack.c.bf16 %v2094_v8, %v2091_v59  ;;  %v4890_v10 = vpop.f32.mrf.mxu0  ;;  %4985 = vmatmul.mubr.bf16.gmra.mxu0 %v511_v63  ;;  %v1893_v4 = vld [vmem:[%s5693_s11 + $0x3e0] sm:$0xff] }
 0x174   : > { %4593 = vst [vmem:[%s5920_s13 + $0x20] sm:$0xff] %v3973_v7   ;;  %v5034_v11 = vpop.f32.mrf.mxu1  ;;  %5129 = vmatmul.mubr.bf16.gmra.mxu1 %v1952_v2  ;;  %4988 = vmatprep.mubr.bf16.mxu0 %v512_v3  ;;  %v453_v2 = vld [vmem:[%s5686_s30 + $0x3e8] sm:$0xff]  ;;  %v517_v7 = vpack.c.bf16 %v451_v61, %v450_v60  ;;  %v1959_v14 = vpack.c.bf16 %v1894_v5, %v1893_v4  ;;  %s5471_s30 = smov [#allocation10]  }
 0x175   : > { %4656 = vst [vmem:[%s5923_s17 + $0x20] sm:$0xff] %v4293_v9   ;;  %v666_v15 = vpop.f32.mrf.mxu0  ;;  %5132 = vmatprep.mubr.bf16.mxu1 %v1953_v6  ;;  %s5359_s0 = sshll.u32 %s5471_s30, 4  ;;  %s5360_s0 = int_to_ptr.vmem [resolvable:$false] %s5359_s0 }
 0x176   : > { %v2107_v19 = vpop.f32.mrf.mxu1  ;;  %s5361_s26 = scalar_lea.vmem %s5360_s0, 16384  ;;  %p5362_p5 = scmp.lt.s32.totalorder %s6100_s14, %s5360_s0 }
 0x177   : > { %v4891_v22 = vpop.f32.mrf.mxu0  ;;  %p5363_p1 = scmp.lt.s32.totalorder %s5361_s26, %s5355_s10 }
 0x178   : > { %v3988_v24 = vpack.c.bf16 %v4891_v22, %v4890_v10  ;;  %v5035_v25 = vpop.f32.mrf.mxu1  ;;  %v1958_v10 = vpack.c.bf16 %v1892_v0, %v1891_v62 }
 0x179   : > { %v4308_v28 = vpack.c.bf16 %v5035_v25, %v5034_v11  ;;  %v669_v29 = vpop.f32.mrf.mxu0  ;;  %v518_v11 = vpack.c.bf16 %v453_v2, %v452_v1  ;;  %p5364_p4 = por %p5363_p1, %p5362_p5 }
 0x17a   : > { %4596 = vst [vmem:[%s5920_s13 + $0x38] sm:$0xff] %v3988_v24   ;;  %v3983_v31 = vpack.c.bf16 %v669_v29, %v666_v15  ;;  %v2110_v32 = vpop.f32.mrf.mxu1  ;;  %v1896_v24 = vld [vmem:[%s5693_s11 + $0x3f8] sm:$0xff] }
 0x17b   : > { %4659 = vst [vmem:[%s5923_s17 + $0x38] sm:$0xff] %v4308_v28   ;;  %v4303_v33 = vpack.c.bf16 %v2110_v32, %v2107_v19  ;;  %v4894_v34 = vpop.f32.mrf.mxu0  ;;  %4989 = vmatmul.mubr.bf16.gmra.mxu0 %v513_v23  ;;  %v1895_v23 = vld [vmem:[%s5693_s11 + $0x3f0] sm:$0xff]  ;;  %p5365_p3 = pnand %p5364_p4, %p5358_p13 }
 0x17c   : > { %4595 = vst [vmem:[%s5920_s13 + $0x30] sm:$0xff] %v3983_v31   ;;  %v5038_v35 = vpop.f32.mrf.mxu1  ;;  %5133 = vmatmul.mubr.bf16.gmra.mxu1 %v1954_v26  ;;  %4992 = vmatprep.mubr.bf16.mxu0 %v514_v27  ;;  %v519_v27 = vpack.c.bf16 %v455_v21, %v454_v20 }
 0x17d   : > { %4658 = vst [vmem:[%s5923_s17 + $0x30] sm:$0xff] %v4303_v33   ;;  %v682_v39 = vpop.f32.mrf.mxu0  ;;  %5136 = vmatprep.mubr.bf16.mxu1 %v1955_v30  ;;  %v1960_v30 = vpack.c.bf16 %v1896_v24, %v1895_v23 }
 0x17e   : > { %v2123_v43 = vpop.f32.mrf.mxu1 }
 0x17f   : > { %v4895_v46 = vpop.f32.mrf.mxu0 }
 0x180   : > { %v3998_v48 = vpack.c.bf16 %v4895_v46, %v4894_v34  ;;  %v5039_v49 = vpop.f32.mrf.mxu1 }
 0x181   : > { %v4318_v52 = vpack.c.bf16 %v5039_v49, %v5038_v35  ;;  %v685_v53 = vpop.f32.mrf.mxu0 }
 0x182   : > { %4598 = vst [vmem:[%s5920_s13 + $0x48] sm:$0xff] %v3998_v48   ;;  %v3993_v55 = vpack.c.bf16 %v685_v53, %v682_v39  ;;  %v2126_v56 = vpop.f32.mrf.mxu1 }
 0x183   : > { %4661 = vst [vmem:[%s5923_s17 + $0x48] sm:$0xff] %v4318_v52   ;;  %v4313_v57 = vpack.c.bf16 %v2126_v56, %v2123_v43  ;;  %v4898_v58 = vpop.f32.mrf.mxu0  ;;  %4993 = vmatmul.mubr.bf16.gmra.mxu0 %v515_v47 }
 0x184   : > { %4597 = vst [vmem:[%s5920_s13 + $0x40] sm:$0xff] %v3993_v55   ;;  %v5042_v59 = vpop.f32.mrf.mxu1  ;;  %5137 = vmatmul.mubr.bf16.gmra.mxu1 %v1956_v50  ;;  %4996 = vmatprep.mubr.bf16.mxu0 %v516_v51 }
 0x185   : > { %4660 = vst [vmem:[%s5923_s17 + $0x40] sm:$0xff] %v4313_v57   ;;  %v698_v63 = vpop.f32.mrf.mxu0  ;;  %5140 = vmatprep.mubr.bf16.mxu1 %v1957_v54 }
 0x186   : > { %v2139_v3 = vpop.f32.mrf.mxu1 }
 0x187   : > { %v4899_v6 = vpop.f32.mrf.mxu0 }
 0x188   : > { %v4008_v8 = vpack.c.bf16 %v4899_v6, %v4898_v58  ;;  %v5043_v9 = vpop.f32.mrf.mxu1 }
 0x189   : > { %v4328_v12 = vpack.c.bf16 %v5043_v9, %v5042_v59  ;;  %v701_v13 = vpop.f32.mrf.mxu0 }
 0x18a   : > { %4600 = vst [vmem:[%s5920_s13 + $0x58] sm:$0xff] %v4008_v8   ;;  %v4003_v15 = vpack.c.bf16 %v701_v13, %v698_v63  ;;  %v2142_v16 = vpop.f32.mrf.mxu1 }
 0x18b   : > { %4663 = vst [vmem:[%s5923_s17 + $0x58] sm:$0xff] %v4328_v12   ;;  %v4323_v17 = vpack.c.bf16 %v2142_v16, %v2139_v3  ;;  %v4902_v18 = vpop.f32.mrf.mxu0  ;;  %4997 = vmatmul.mubr.bf16.gmra.mxu0 %v517_v7 }
 0x18c   : > { %4599 = vst [vmem:[%s5920_s13 + $0x50] sm:$0xff] %v4003_v15   ;;  %v5046_v19 = vpop.f32.mrf.mxu1  ;;  %5141 = vmatmul.mubr.bf16.gmra.mxu1 %v1958_v10  ;;  %5000 = vmatprep.mubr.bf16.mxu0 %v518_v11 }
 0x18d   : > { %4662 = vst [vmem:[%s5923_s17 + $0x50] sm:$0xff] %v4323_v17   ;;  %v714_v22 = vpop.f32.mrf.mxu0  ;;  %5144 = vmatprep.mubr.bf16.mxu1 %v1959_v14 }
 0x18e   : > { %v2155_v25 = vpop.f32.mrf.mxu1 }
 0x18f   : > { %v4903_v26 = vpop.f32.mrf.mxu0 }
 0x190   : > { %v4018_v28 = vpack.c.bf16 %v4903_v26, %v4902_v18  ;;  %v5047_v29 = vpop.f32.mrf.mxu1 }
 0x191   : > { %v4338_v31 = vpack.c.bf16 %v5047_v29, %v5046_v19  ;;  %v717_v32 = vpop.f32.mrf.mxu0 }
 0x192   : > { %4602 = vst [vmem:[%s5920_s13 + $0x68] sm:$0xff] %v4018_v28   ;;  %v4013_v33 = vpack.c.bf16 %v717_v32, %v714_v22  ;;  %v2158_v34 = vpop.f32.mrf.mxu1 }
 0x193   : > { %4665 = vst [vmem:[%s5923_s17 + $0x68] sm:$0xff] %v4338_v31   ;;  %v4333_v35 = vpack.c.bf16 %v2158_v34, %v2155_v25  ;;  %v4906_v36 = vpop.f32.mrf.mxu0  ;;  %5001 = vmatmul.mubr.bf16.gmra.mxu0 %v519_v27 }
 0x194   : > { %4601 = vst [vmem:[%s5920_s13 + $0x60] sm:$0xff] %v4013_v33   ;;  %v5050_v37 = vpop.f32.mrf.mxu1  ;;  %5145 = vmatmul.mubr.bf16.gmra.mxu1 %v1960_v30 }
 0x195   : > { %4664 = vst [vmem:[%s5923_s17 + $0x60] sm:$0xff] %v4333_v35   ;;  %v730_v38 = vpop.f32.mrf.mxu0 }
 0x196   : > { %v2171_v39 = vpop.f32.mrf.mxu1 }
 0x197   : > { %v4907_v40 = vpop.f32.mrf.mxu0 }
 0x198   : > { %v4028_v41 = vpack.c.bf16 %v4907_v40, %v4906_v36  ;;  %v5051_v42 = vpop.f32.mrf.mxu1 }
 0x199   : > { %v4348_v43 = vpack.c.bf16 %v5051_v42, %v5050_v37  ;;  %v733_v44 = vpop.f32.mrf.mxu0 }
 0x19a   : > { %4604 = vst [vmem:[%s5920_s13 + $0x78] sm:$0xff] %v4028_v41   ;;  %v4023_v45 = vpack.c.bf16 %v733_v44, %v730_v38  ;;  %v2174_v46 = vpop.f32.mrf.mxu1 }
 0x19b   : > { %4667 = vst [vmem:[%s5923_s17 + $0x78] sm:$0xff] %v4348_v43   ;;  %v4343_v47 = vpack.c.bf16 %v2174_v46, %v2171_v39  ;;  %v4910_v48 = vpop.f32.mrf.mxu0 }
 0x19c   : > { %4603 = vst [vmem:[%s5920_s13 + $0x70] sm:$0xff] %v4023_v45   ;;  %v5054_v49 = vpop.f32.mrf.mxu1 }
 0x19d   : > { %4666 = vst [vmem:[%s5923_s17 + $0x70] sm:$0xff] %v4343_v47   ;;  %v746_v50 = vpop.f32.mrf.mxu0 }
 0x19e   : > { %v2187_v51 = vpop.f32.mrf.mxu1 }
 0x19f   : > { %v4911_v52 = vpop.f32.mrf.mxu0 }
 0x1a0   : > { %v4038_v53 = vpack.c.bf16 %v4911_v52, %v4910_v48  ;;  %v5055_v54 = vpop.f32.mrf.mxu1 }
 0x1a1   : > { %v4358_v55 = vpack.c.bf16 %v5055_v54, %v5054_v49  ;;  %v749_v56 = vpop.f32.mrf.mxu0 }
 0x1a2   : > { %4606 = vst [vmem:[%s5920_s13 + $0x88] sm:$0xff] %v4038_v53   ;;  %v4033_v57 = vpack.c.bf16 %v749_v56, %v746_v50  ;;  %v2190_v58 = vpop.f32.mrf.mxu1 }
 0x1a3   : > { %4669 = vst [vmem:[%s5923_s17 + $0x88] sm:$0xff] %v4358_v55   ;;  %v4353_v59 = vpack.c.bf16 %v2190_v58, %v2187_v51  ;;  %v4914_v60 = vpop.f32.mrf.mxu0 }
 0x1a4   : > { %4605 = vst [vmem:[%s5920_s13 + $0x80] sm:$0xff] %v4033_v57   ;;  %v5058_v61 = vpop.f32.mrf.mxu1 }
 0x1a5   : > { %4668 = vst [vmem:[%s5923_s17 + $0x80] sm:$0xff] %v4353_v59   ;;  %v762_v62 = vpop.f32.mrf.mxu0 }
 0x1a6   : > { %v2203_v63 = vpop.f32.mrf.mxu1 }
 0x1a7   : > { %v4915_v0 = vpop.f32.mrf.mxu0 }
 0x1a8   : > { %v4048_v1 = vpack.c.bf16 %v4915_v0, %v4914_v60  ;;  %v5059_v2 = vpop.f32.mrf.mxu1 }
 0x1a9   : > { %v4368_v3 = vpack.c.bf16 %v5059_v2, %v5058_v61  ;;  %v765_v4 = vpop.f32.mrf.mxu0 }
 0x1aa   : > { %4608 = vst [vmem:[%s5920_s13 + $0x98] sm:$0xff] %v4048_v1   ;;  %v4043_v5 = vpack.c.bf16 %v765_v4, %v762_v62  ;;  %v2206_v6 = vpop.f32.mrf.mxu1 }
 0x1ab   : > { %4671 = vst [vmem:[%s5923_s17 + $0x98] sm:$0xff] %v4368_v3   ;;  %v4363_v7 = vpack.c.bf16 %v2206_v6, %v2203_v63  ;;  %v4918_v8 = vpop.f32.mrf.mxu0 }
 0x1ac   : > { %4607 = vst [vmem:[%s5920_s13 + $0x90] sm:$0xff] %v4043_v5   ;;  %v5062_v9 = vpop.f32.mrf.mxu1 }
 0x1ad   : > { %4670 = vst [vmem:[%s5923_s17 + $0x90] sm:$0xff] %v4363_v7   ;;  %v778_v10 = vpop.f32.mrf.mxu0 }
 0x1ae   : > { %v2219_v11 = vpop.f32.mrf.mxu1 }
 0x1af   : > { %v4919_v12 = vpop.f32.mrf.mxu0 }
 0x1b0   : > { %v4058_v13 = vpack.c.bf16 %v4919_v12, %v4918_v8  ;;  %v5063_v14 = vpop.f32.mrf.mxu1 }
 0x1b1   : > { %v4378_v15 = vpack.c.bf16 %v5063_v14, %v5062_v9  ;;  %v781_v16 = vpop.f32.mrf.mxu0 }
 0x1b2   : > { %4610 = vst [vmem:[%s5920_s13 + $0xa8] sm:$0xff] %v4058_v13   ;;  %v4053_v17 = vpack.c.bf16 %v781_v16, %v778_v10  ;;  %v2222_v18 = vpop.f32.mrf.mxu1 }
 0x1b3   : > { %4673 = vst [vmem:[%s5923_s17 + $0xa8] sm:$0xff] %v4378_v15   ;;  %v4373_v19 = vpack.c.bf16 %v2222_v18, %v2219_v11  ;;  %v4922_v20 = vpop.f32.mrf.mxu0 }
 0x1b4   : > { %4609 = vst [vmem:[%s5920_s13 + $0xa0] sm:$0xff] %v4053_v17   ;;  %v5066_v21 = vpop.f32.mrf.mxu1 }
 0x1b5   : > { %4672 = vst [vmem:[%s5923_s17 + $0xa0] sm:$0xff] %v4373_v19   ;;  %v794_v22 = vpop.f32.mrf.mxu0 }
 0x1b6   : > { %v2235_v23 = vpop.f32.mrf.mxu1 }
 0x1b7   : > { %v4923_v24 = vpop.f32.mrf.mxu0 }
 0x1b8   : > { %v4068_v25 = vpack.c.bf16 %v4923_v24, %v4922_v20  ;;  %v5067_v26 = vpop.f32.mrf.mxu1 }
 0x1b9   : > { %v4388_v27 = vpack.c.bf16 %v5067_v26, %v5066_v21  ;;  %v797_v28 = vpop.f32.mrf.mxu0 }
 0x1ba   : > { %4612 = vst [vmem:[%s5920_s13 + $0xb8] sm:$0xff] %v4068_v25   ;;  %v4063_v29 = vpack.c.bf16 %v797_v28, %v794_v22  ;;  %v2238_v30 = vpop.f32.mrf.mxu1 }
 0x1bb   : > { %4675 = vst [vmem:[%s5923_s17 + $0xb8] sm:$0xff] %v4388_v27   ;;  %v4383_v31 = vpack.c.bf16 %v2238_v30, %v2235_v23  ;;  %v4926_v32 = vpop.f32.mrf.mxu0 }
 0x1bc   : > { %4611 = vst [vmem:[%s5920_s13 + $0xb0] sm:$0xff] %v4063_v29   ;;  %v5070_v33 = vpop.f32.mrf.mxu1 }
 0x1bd   : > { %4674 = vst [vmem:[%s5923_s17 + $0xb0] sm:$0xff] %v4383_v31   ;;  %v810_v34 = vpop.f32.mrf.mxu0 }
 0x1be   : > { %v2251_v35 = vpop.f32.mrf.mxu1 }
 0x1bf   : > { %v4927_v36 = vpop.f32.mrf.mxu0 }
 0x1c0   : > { %v4078_v37 = vpack.c.bf16 %v4927_v36, %v4926_v32  ;;  %v5071_v38 = vpop.f32.mrf.mxu1 }
 0x1c1   : > { %v4398_v39 = vpack.c.bf16 %v5071_v38, %v5070_v33  ;;  %v813_v40 = vpop.f32.mrf.mxu0 }
 0x1c2   : > { %4614 = vst [vmem:[%s5920_s13 + $0xc8] sm:$0xff] %v4078_v37   ;;  %v4073_v41 = vpack.c.bf16 %v813_v40, %v810_v34  ;;  %v2254_v42 = vpop.f32.mrf.mxu1 }
 0x1c3   : > { %4677 = vst [vmem:[%s5923_s17 + $0xc8] sm:$0xff] %v4398_v39   ;;  %v4393_v43 = vpack.c.bf16 %v2254_v42, %v2251_v35  ;;  %v4930_v44 = vpop.f32.mrf.mxu0 }
 0x1c4   : > { %4613 = vst [vmem:[%s5920_s13 + $0xc0] sm:$0xff] %v4073_v41   ;;  %v5074_v45 = vpop.f32.mrf.mxu1 }
 0x1c5   : > { %4676 = vst [vmem:[%s5923_s17 + $0xc0] sm:$0xff] %v4393_v43   ;;  %v826_v46 = vpop.f32.mrf.mxu0 }
 0x1c6   : > { %v2267_v47 = vpop.f32.mrf.mxu1 }
 0x1c7   : > { %v4931_v48 = vpop.f32.mrf.mxu0 }
 0x1c8   : > { %v4088_v49 = vpack.c.bf16 %v4931_v48, %v4930_v44  ;;  %v5075_v50 = vpop.f32.mrf.mxu1 }
 0x1c9   : > { %v4408_v51 = vpack.c.bf16 %v5075_v50, %v5074_v45  ;;  %v829_v52 = vpop.f32.mrf.mxu0 }
 0x1ca   : > { %4616 = vst [vmem:[%s5920_s13 + $0xd8] sm:$0xff] %v4088_v49   ;;  %v4083_v53 = vpack.c.bf16 %v829_v52, %v826_v46  ;;  %v2270_v54 = vpop.f32.mrf.mxu1 }
 0x1cb   : > { %4679 = vst [vmem:[%s5923_s17 + $0xd8] sm:$0xff] %v4408_v51   ;;  %v4403_v55 = vpack.c.bf16 %v2270_v54, %v2267_v47  ;;  %v4934_v56 = vpop.f32.mrf.mxu0 }
 0x1cc   : > { %4615 = vst [vmem:[%s5920_s13 + $0xd0] sm:$0xff] %v4083_v53   ;;  %v5078_v57 = vpop.f32.mrf.mxu1 }
 0x1cd   : > { %4678 = vst [vmem:[%s5923_s17 + $0xd0] sm:$0xff] %v4403_v55   ;;  %v842_v58 = vpop.f32.mrf.mxu0 }
 0x1ce   : > { %v2283_v59 = vpop.f32.mrf.mxu1 }
 0x1cf   : > { %v4935_v60 = vpop.f32.mrf.mxu0 }
 0x1d0   : > { %v4098_v61 = vpack.c.bf16 %v4935_v60, %v4934_v56  ;;  %v5079_v62 = vpop.f32.mrf.mxu1 }
 0x1d1   : > { %v4418_v63 = vpack.c.bf16 %v5079_v62, %v5078_v57  ;;  %v845_v0 = vpop.f32.mrf.mxu0 }
 0x1d2   : > { %4618 = vst [vmem:[%s5920_s13 + $0xe8] sm:$0xff] %v4098_v61   ;;  %v4093_v1 = vpack.c.bf16 %v845_v0, %v842_v58  ;;  %v2286_v2 = vpop.f32.mrf.mxu1 }
 0x1d3   : > { %4681 = vst [vmem:[%s5923_s17 + $0xe8] sm:$0xff] %v4418_v63   ;;  %v4413_v3 = vpack.c.bf16 %v2286_v2, %v2283_v59  ;;  %v4938_v4 = vpop.f32.mrf.mxu0 }
 0x1d4   : > { %4617 = vst [vmem:[%s5920_s13 + $0xe0] sm:$0xff] %v4093_v1   ;;  %v5082_v5 = vpop.f32.mrf.mxu1 }
 0x1d5   : > { %4680 = vst [vmem:[%s5923_s17 + $0xe0] sm:$0xff] %v4413_v3   ;;  %v858_v6 = vpop.f32.mrf.mxu0 }
 0x1d6   : > { %v2299_v7 = vpop.f32.mrf.mxu1 }
 0x1d7   : > { %v4939_v8 = vpop.f32.mrf.mxu0 }
 0x1d8   : > { %v4108_v9 = vpack.c.bf16 %v4939_v8, %v4938_v4  ;;  %v5083_v10 = vpop.f32.mrf.mxu1 }
 0x1d9   : > { %v4428_v11 = vpack.c.bf16 %v5083_v10, %v5082_v5  ;;  %v861_v12 = vpop.f32.mrf.mxu0 }
 0x1da   : > { %4620 = vst [vmem:[%s5920_s13 + $0xf8] sm:$0xff] %v4108_v9   ;;  %v4103_v13 = vpack.c.bf16 %v861_v12, %v858_v6  ;;  %v2302_v14 = vpop.f32.mrf.mxu1 }
 0x1db   : > { %4683 = vst [vmem:[%s5923_s17 + $0xf8] sm:$0xff] %v4428_v11   ;;  %v4423_v15 = vpack.c.bf16 %v2302_v14, %v2299_v7  ;;  %v4942_v16 = vpop.f32.mrf.mxu0 }
 0x1dc   : > { %4619 = vst [vmem:[%s5920_s13 + $0xf0] sm:$0xff] %v4103_v13   ;;  %v5086_v17 = vpop.f32.mrf.mxu1 }
 0x1dd   : > { %4682 = vst [vmem:[%s5923_s17 + $0xf0] sm:$0xff] %v4423_v15   ;;  %v874_v18 = vpop.f32.mrf.mxu0 }
 0x1de   : > { %v2315_v19 = vpop.f32.mrf.mxu1 }
 0x1df   : > { %v4943_v20 = vpop.f32.mrf.mxu0 }
 0x1e0   : > { %v4118_v21 = vpack.c.bf16 %v4943_v20, %v4942_v16  ;;  %v5087_v22 = vpop.f32.mrf.mxu1 }
 0x1e1   : > { %v4438_v23 = vpack.c.bf16 %v5087_v22, %v5086_v17  ;;  %v877_v24 = vpop.f32.mrf.mxu0 }
 0x1e2   : > { %4622 = vst [vmem:[%s5920_s13 + $0x108] sm:$0xff] %v4118_v21   ;;  %v4113_v25 = vpack.c.bf16 %v877_v24, %v874_v18  ;;  %v2318_v26 = vpop.f32.mrf.mxu1 }
 0x1e3   : > { %4685 = vst [vmem:[%s5923_s17 + $0x108] sm:$0xff] %v4438_v23   ;;  %v4433_v27 = vpack.c.bf16 %v2318_v26, %v2315_v19  ;;  %v4946_v28 = vpop.f32.mrf.mxu0 }
 0x1e4   : > { %4621 = vst [vmem:[%s5920_s13 + $0x100] sm:$0xff] %v4113_v25   ;;  %v5090_v29 = vpop.f32.mrf.mxu1 }
 0x1e5   : > { %4684 = vst [vmem:[%s5923_s17 + $0x100] sm:$0xff] %v4433_v27   ;;  %v890_v30 = vpop.f32.mrf.mxu0 }
 0x1e6   : > { %v2331_v31 = vpop.f32.mrf.mxu1 }
 0x1e7   : > { %v4947_v32 = vpop.f32.mrf.mxu0 }
 0x1e8   : > { %v4128_v33 = vpack.c.bf16 %v4947_v32, %v4946_v28  ;;  %v5091_v34 = vpop.f32.mrf.mxu1 }
 0x1e9   : > { %v4448_v35 = vpack.c.bf16 %v5091_v34, %v5090_v29  ;;  %v893_v36 = vpop.f32.mrf.mxu0 }
 0x1ea   : > { %4624 = vst [vmem:[%s5920_s13 + $0x118] sm:$0xff] %v4128_v33   ;;  %v4123_v37 = vpack.c.bf16 %v893_v36, %v890_v30  ;;  %v2334_v38 = vpop.f32.mrf.mxu1 }
 0x1eb   : > { %4687 = vst [vmem:[%s5923_s17 + $0x118] sm:$0xff] %v4448_v35   ;;  %v4443_v39 = vpack.c.bf16 %v2334_v38, %v2331_v31  ;;  %v4950_v40 = vpop.f32.mrf.mxu0 }
 0x1ec   : > { %4623 = vst [vmem:[%s5920_s13 + $0x110] sm:$0xff] %v4123_v37   ;;  %v5094_v41 = vpop.f32.mrf.mxu1 }
 0x1ed   : > { %4686 = vst [vmem:[%s5923_s17 + $0x110] sm:$0xff] %v4443_v39   ;;  %v906_v42 = vpop.f32.mrf.mxu0 }
 0x1ee   : > { %v2347_v43 = vpop.f32.mrf.mxu1 }
 0x1ef   : > { %v4951_v44 = vpop.f32.mrf.mxu0 }
 0x1f0   : > { %v4138_v45 = vpack.c.bf16 %v4951_v44, %v4950_v40  ;;  %v5095_v46 = vpop.f32.mrf.mxu1 }
 0x1f1   : > { %v4458_v47 = vpack.c.bf16 %v5095_v46, %v5094_v41  ;;  %v909_v48 = vpop.f32.mrf.mxu0 }
 0x1f2   : > { %4626 = vst [vmem:[%s5920_s13 + $0x128] sm:$0xff] %v4138_v45   ;;  %v4133_v49 = vpack.c.bf16 %v909_v48, %v906_v42  ;;  %v2350_v50 = vpop.f32.mrf.mxu1 }
 0x1f3   : > { %4689 = vst [vmem:[%s5923_s17 + $0x128] sm:$0xff] %v4458_v47   ;;  %v4453_v51 = vpack.c.bf16 %v2350_v50, %v2347_v43  ;;  %v4954_v52 = vpop.f32.mrf.mxu0 }
 0x1f4   : > { %4625 = vst [vmem:[%s5920_s13 + $0x120] sm:$0xff] %v4133_v49   ;;  %v5098_v53 = vpop.f32.mrf.mxu1 }
 0x1f5   : > { %4688 = vst [vmem:[%s5923_s17 + $0x120] sm:$0xff] %v4453_v51   ;;  %v922_v54 = vpop.f32.mrf.mxu0 }
 0x1f6   : > { %v2363_v55 = vpop.f32.mrf.mxu1 }
 0x1f7   : > { %v4955_v56 = vpop.f32.mrf.mxu0 }
 0x1f8   : > { %v4148_v57 = vpack.c.bf16 %v4955_v56, %v4954_v52  ;;  %v5099_v58 = vpop.f32.mrf.mxu1 }
 0x1f9   : > { %v4468_v59 = vpack.c.bf16 %v5099_v58, %v5098_v53  ;;  %v925_v60 = vpop.f32.mrf.mxu0 }
 0x1fa   : > { %4628 = vst [vmem:[%s5920_s13 + $0x138] sm:$0xff] %v4148_v57   ;;  %v4143_v61 = vpack.c.bf16 %v925_v60, %v922_v54  ;;  %v2366_v62 = vpop.f32.mrf.mxu1 }
 0x1fb   : > { %4691 = vst [vmem:[%s5923_s17 + $0x138] sm:$0xff] %v4468_v59   ;;  %v4463_v63 = vpack.c.bf16 %v2366_v62, %v2363_v55  ;;  %v4958_v0 = vpop.f32.mrf.mxu0 }
 0x1fc   : > { %4627 = vst [vmem:[%s5920_s13 + $0x130] sm:$0xff] %v4143_v61   ;;  %v5102_v1 = vpop.f32.mrf.mxu1 }
 0x1fd   : > { %4690 = vst [vmem:[%s5923_s17 + $0x130] sm:$0xff] %v4463_v63   ;;  %v938_v2 = vpop.f32.mrf.mxu0 }
 0x1fe   : > { %v2379_v3 = vpop.f32.mrf.mxu1 }
 0x1ff   : > { %v4959_v4 = vpop.f32.mrf.mxu0 }
 0x200   : > { %v4158_v5 = vpack.c.bf16 %v4959_v4, %v4958_v0  ;;  %v5103_v6 = vpop.f32.mrf.mxu1 }
 0x201   : > { %v4478_v7 = vpack.c.bf16 %v5103_v6, %v5102_v1  ;;  %v941_v8 = vpop.f32.mrf.mxu0 }
 0x202   : > { %4630 = vst [vmem:[%s5920_s13 + $0x148] sm:$0xff] %v4158_v5   ;;  %v4153_v9 = vpack.c.bf16 %v941_v8, %v938_v2  ;;  %v2382_v10 = vpop.f32.mrf.mxu1 }
 0x203   : > { %4693 = vst [vmem:[%s5923_s17 + $0x148] sm:$0xff] %v4478_v7   ;;  %v4473_v11 = vpack.c.bf16 %v2382_v10, %v2379_v3  ;;  %v4962_v12 = vpop.f32.mrf.mxu0 }
 0x204   : > { %4629 = vst [vmem:[%s5920_s13 + $0x140] sm:$0xff] %v4153_v9   ;;  %v5106_v13 = vpop.f32.mrf.mxu1 }
 0x205   : > { %4692 = vst [vmem:[%s5923_s17 + $0x140] sm:$0xff] %v4473_v11   ;;  %v954_v14 = vpop.f32.mrf.mxu0 }
 0x206   : > { %v2395_v15 = vpop.f32.mrf.mxu1 }
 0x207   : > { %v4963_v16 = vpop.f32.mrf.mxu0 }
 0x208   : > { %v4168_v17 = vpack.c.bf16 %v4963_v16, %v4962_v12  ;;  %v5107_v18 = vpop.f32.mrf.mxu1 }
 0x209   : > { %v4488_v19 = vpack.c.bf16 %v5107_v18, %v5106_v13  ;;  %v957_v20 = vpop.f32.mrf.mxu0 }
 0x20a   : > { %4632 = vst [vmem:[%s5920_s13 + $0x158] sm:$0xff] %v4168_v17   ;;  %v4163_v21 = vpack.c.bf16 %v957_v20, %v954_v14  ;;  %v2398_v22 = vpop.f32.mrf.mxu1 }
 0x20b   : > { %4695 = vst [vmem:[%s5923_s17 + $0x158] sm:$0xff] %v4488_v19   ;;  %v4483_v23 = vpack.c.bf16 %v2398_v22, %v2395_v15  ;;  %v4966_v24 = vpop.f32.mrf.mxu0 }
 0x20c   : > { %4631 = vst [vmem:[%s5920_s13 + $0x150] sm:$0xff] %v4163_v21   ;;  %v5110_v25 = vpop.f32.mrf.mxu1 }
 0x20d   : > { %4694 = vst [vmem:[%s5923_s17 + $0x150] sm:$0xff] %v4483_v23   ;;  %v970_v26 = vpop.f32.mrf.mxu0 }
 0x20e   : > { %v2411_v27 = vpop.f32.mrf.mxu1 }
 0x20f   : > { %v4967_v28 = vpop.f32.mrf.mxu0 }
 0x210   : > { %v4178_v29 = vpack.c.bf16 %v4967_v28, %v4966_v24  ;;  %v5111_v30 = vpop.f32.mrf.mxu1 }
 0x211   : > { %v4498_v31 = vpack.c.bf16 %v5111_v30, %v5110_v25  ;;  %v973_v32 = vpop.f32.mrf.mxu0 }
 0x212   : > { %4634 = vst [vmem:[%s5920_s13 + $0x168] sm:$0xff] %v4178_v29   ;;  %v4173_v33 = vpack.c.bf16 %v973_v32, %v970_v26  ;;  %v2414_v34 = vpop.f32.mrf.mxu1 }
 0x213   : > { %4697 = vst [vmem:[%s5923_s17 + $0x168] sm:$0xff] %v4498_v31   ;;  %v4493_v35 = vpack.c.bf16 %v2414_v34, %v2411_v27  ;;  %v4970_v36 = vpop.f32.mrf.mxu0 }
 0x214   : > { %4633 = vst [vmem:[%s5920_s13 + $0x160] sm:$0xff] %v4173_v33   ;;  %v5114_v37 = vpop.f32.mrf.mxu1 }
 0x215   : > { %4696 = vst [vmem:[%s5923_s17 + $0x160] sm:$0xff] %v4493_v35   ;;  %v986_v38 = vpop.f32.mrf.mxu0 }
 0x216   : > { %v2427_v39 = vpop.f32.mrf.mxu1 }
 0x217   : > { %v4971_v40 = vpop.f32.mrf.mxu0 }
 0x218   : > { %v4188_v41 = vpack.c.bf16 %v4971_v40, %v4970_v36  ;;  %v5115_v42 = vpop.f32.mrf.mxu1 }
 0x219   : > { %v4508_v43 = vpack.c.bf16 %v5115_v42, %v5114_v37  ;;  %v989_v44 = vpop.f32.mrf.mxu0 }
 0x21a   : > { %4636 = vst [vmem:[%s5920_s13 + $0x178] sm:$0xff] %v4188_v41   ;;  %v4183_v45 = vpack.c.bf16 %v989_v44, %v986_v38  ;;  %v2430_v46 = vpop.f32.mrf.mxu1 }
 0x21b   : > { %4699 = vst [vmem:[%s5923_s17 + $0x178] sm:$0xff] %v4508_v43   ;;  %v4503_v47 = vpack.c.bf16 %v2430_v46, %v2427_v39  ;;  %v4974_v48 = vpop.f32.mrf.mxu0 }
 0x21c   : > { %4635 = vst [vmem:[%s5920_s13 + $0x170] sm:$0xff] %v4183_v45   ;;  %v5118_v49 = vpop.f32.mrf.mxu1 }
 0x21d   : > { %4698 = vst [vmem:[%s5923_s17 + $0x170] sm:$0xff] %v4503_v47   ;;  %v1002_v50 = vpop.f32.mrf.mxu0 }
 0x21e   : > { %v2443_v51 = vpop.f32.mrf.mxu1 }
 0x21f   : > { %v4975_v52 = vpop.f32.mrf.mxu0 }
 0x220   : > { %v4198_v53 = vpack.c.bf16 %v4975_v52, %v4974_v48  ;;  %v5119_v54 = vpop.f32.mrf.mxu1 }
 0x221   : > { %v4518_v55 = vpack.c.bf16 %v5119_v54, %v5118_v49  ;;  %v1005_v56 = vpop.f32.mrf.mxu0 }
 0x222   : > { %4638 = vst [vmem:[%s5920_s13 + $0x188] sm:$0xff] %v4198_v53   ;;  %v4193_v57 = vpack.c.bf16 %v1005_v56, %v1002_v50  ;;  %v2446_v58 = vpop.f32.mrf.mxu1 }
 0x223   : > { %4701 = vst [vmem:[%s5923_s17 + $0x188] sm:$0xff] %v4518_v55   ;;  %v4513_v59 = vpack.c.bf16 %v2446_v58, %v2443_v51  ;;  %v4978_v60 = vpop.f32.mrf.mxu0 }
 0x224   : > { %4637 = vst [vmem:[%s5920_s13 + $0x180] sm:$0xff] %v4193_v57   ;;  %v5122_v61 = vpop.f32.mrf.mxu1 }
 0x225   : > { %4700 = vst [vmem:[%s5923_s17 + $0x180] sm:$0xff] %v4513_v59   ;;  %v1018_v62 = vpop.f32.mrf.mxu0 }
 0x226   : > { %v2459_v63 = vpop.f32.mrf.mxu1 }
 0x227   : > { %v4979_v0 = vpop.f32.mrf.mxu0 }
 0x228   : > { %v4208_v1 = vpack.c.bf16 %v4979_v0, %v4978_v60  ;;  %v5123_v2 = vpop.f32.mrf.mxu1 }
 0x229   : > { %v4528_v3 = vpack.c.bf16 %v5123_v2, %v5122_v61  ;;  %v1021_v4 = vpop.f32.mrf.mxu0 }
 0x22a   : > { %4640 = vst [vmem:[%s5920_s13 + $0x198] sm:$0xff] %v4208_v1   ;;  %v4203_v5 = vpack.c.bf16 %v1021_v4, %v1018_v62  ;;  %v2462_v6 = vpop.f32.mrf.mxu1 }
 0x22b   : > { %4703 = vst [vmem:[%s5923_s17 + $0x198] sm:$0xff] %v4528_v3   ;;  %v4523_v7 = vpack.c.bf16 %v2462_v6, %v2459_v63  ;;  %v4982_v8 = vpop.f32.mrf.mxu0 }
 0x22c   : > { %4639 = vst [vmem:[%s5920_s13 + $0x190] sm:$0xff] %v4203_v5   ;;  %v5126_v9 = vpop.f32.mrf.mxu1 }
 0x22d   : > { %4702 = vst [vmem:[%s5923_s17 + $0x190] sm:$0xff] %v4523_v7   ;;  %v1034_v10 = vpop.f32.mrf.mxu0 }
 0x22e   : > { %v2475_v11 = vpop.f32.mrf.mxu1 }
 0x22f   : > { %v4983_v12 = vpop.f32.mrf.mxu0 }
 0x230   : > { %v4218_v13 = vpack.c.bf16 %v4983_v12, %v4982_v8  ;;  %v5127_v14 = vpop.f32.mrf.mxu1 }
 0x231   : > { %v4538_v15 = vpack.c.bf16 %v5127_v14, %v5126_v9  ;;  %v1037_v16 = vpop.f32.mrf.mxu0 }
 0x232   : > { %4642 = vst [vmem:[%s5920_s13 + $0x1a8] sm:$0xff] %v4218_v13   ;;  %v4213_v17 = vpack.c.bf16 %v1037_v16, %v1034_v10  ;;  %v2478_v18 = vpop.f32.mrf.mxu1 }
 0x233   : > { %4705 = vst [vmem:[%s5923_s17 + $0x1a8] sm:$0xff] %v4538_v15   ;;  %v4533_v19 = vpack.c.bf16 %v2478_v18, %v2475_v11  ;;  %v4986_v20 = vpop.f32.mrf.mxu0 }
 0x234   : > { %4641 = vst [vmem:[%s5920_s13 + $0x1a0] sm:$0xff] %v4213_v17   ;;  %v5130_v21 = vpop.f32.mrf.mxu1 }
 0x235   : > { %4704 = vst [vmem:[%s5923_s17 + $0x1a0] sm:$0xff] %v4533_v19   ;;  %v1050_v22 = vpop.f32.mrf.mxu0 }
 0x236   : > { %v2491_v23 = vpop.f32.mrf.mxu1 }
 0x237   : > { %v4987_v24 = vpop.f32.mrf.mxu0 }
 0x238   : > { %v4228_v25 = vpack.c.bf16 %v4987_v24, %v4986_v20  ;;  %v5131_v26 = vpop.f32.mrf.mxu1 }
 0x239   : > { %v4548_v27 = vpack.c.bf16 %v5131_v26, %v5130_v21  ;;  %v1053_v28 = vpop.f32.mrf.mxu0 }
 0x23a   : > { %4644 = vst [vmem:[%s5920_s13 + $0x1b8] sm:$0xff] %v4228_v25   ;;  %v4223_v29 = vpack.c.bf16 %v1053_v28, %v1050_v22  ;;  %v2494_v30 = vpop.f32.mrf.mxu1 }
 0x23b   : > { %4707 = vst [vmem:[%s5923_s17 + $0x1b8] sm:$0xff] %v4548_v27   ;;  %v4543_v31 = vpack.c.bf16 %v2494_v30, %v2491_v23  ;;  %v4990_v32 = vpop.f32.mrf.mxu0 }
 0x23c   : > { %4643 = vst [vmem:[%s5920_s13 + $0x1b0] sm:$0xff] %v4223_v29   ;;  %v5134_v33 = vpop.f32.mrf.mxu1 }
 0x23d   : > { %4706 = vst [vmem:[%s5923_s17 + $0x1b0] sm:$0xff] %v4543_v31   ;;  %v1066_v34 = vpop.f32.mrf.mxu0 }
 0x23e   : > { %v2507_v35 = vpop.f32.mrf.mxu1 }
 0x23f   : > { %v4991_v36 = vpop.f32.mrf.mxu0 }
 0x240   : > { %v4238_v37 = vpack.c.bf16 %v4991_v36, %v4990_v32  ;;  %v5135_v38 = vpop.f32.mrf.mxu1 }
 0x241   : > { %v4558_v39 = vpack.c.bf16 %v5135_v38, %v5134_v33  ;;  %v1069_v40 = vpop.f32.mrf.mxu0 }
 0x242   : > { %4646 = vst [vmem:[%s5920_s13 + $0x1c8] sm:$0xff] %v4238_v37   ;;  %v4233_v41 = vpack.c.bf16 %v1069_v40, %v1066_v34  ;;  %v2510_v42 = vpop.f32.mrf.mxu1 }
 0x243   : > { %4709 = vst [vmem:[%s5923_s17 + $0x1c8] sm:$0xff] %v4558_v39   ;;  %v4553_v43 = vpack.c.bf16 %v2510_v42, %v2507_v35  ;;  %v4994_v44 = vpop.f32.mrf.mxu0 }
 0x244   : > { %4645 = vst [vmem:[%s5920_s13 + $0x1c0] sm:$0xff] %v4233_v41   ;;  %v5138_v45 = vpop.f32.mrf.mxu1 }
 0x245   : > { %4708 = vst [vmem:[%s5923_s17 + $0x1c0] sm:$0xff] %v4553_v43   ;;  %v1082_v46 = vpop.f32.mrf.mxu0 }
 0x246   : > { %v2523_v47 = vpop.f32.mrf.mxu1 }
 0x247   : > { %v4995_v48 = vpop.f32.mrf.mxu0 }
 0x248   : > { %v4248_v49 = vpack.c.bf16 %v4995_v48, %v4994_v44  ;;  %v5139_v50 = vpop.f32.mrf.mxu1 }
 0x249   : > { %v4568_v51 = vpack.c.bf16 %v5139_v50, %v5138_v45  ;;  %v1085_v52 = vpop.f32.mrf.mxu0 }
 0x24a   : > { %4648 = vst [vmem:[%s5920_s13 + $0x1d8] sm:$0xff] %v4248_v49   ;;  %v4243_v53 = vpack.c.bf16 %v1085_v52, %v1082_v46  ;;  %v2526_v54 = vpop.f32.mrf.mxu1 }
 0x24b   : > { %4711 = vst [vmem:[%s5923_s17 + $0x1d8] sm:$0xff] %v4568_v51   ;;  %v4563_v55 = vpack.c.bf16 %v2526_v54, %v2523_v47  ;;  %v4998_v56 = vpop.f32.mrf.mxu0 }
 0x24c   : > { %4647 = vst [vmem:[%s5920_s13 + $0x1d0] sm:$0xff] %v4243_v53   ;;  %v5142_v57 = vpop.f32.mrf.mxu1 }
 0x24d   : > { %4710 = vst [vmem:[%s5923_s17 + $0x1d0] sm:$0xff] %v4563_v55   ;;  %v1098_v58 = vpop.f32.mrf.mxu0 }
 0x24e   : > { %v2539_v59 = vpop.f32.mrf.mxu1 }
 0x24f   : > { %v4999_v60 = vpop.f32.mrf.mxu0 }
 0x250   : > { %v4258_v61 = vpack.c.bf16 %v4999_v60, %v4998_v56  ;;  %v5143_v62 = vpop.f32.mrf.mxu1 }
 0x251   : > { %v4578_v63 = vpack.c.bf16 %v5143_v62, %v5142_v57  ;;  %v1101_v0 = vpop.f32.mrf.mxu0 }
 0x252   : > { %4650 = vst [vmem:[%s5920_s13 + $0x1e8] sm:$0xff] %v4258_v61   ;;  %v4253_v1 = vpack.c.bf16 %v1101_v0, %v1098_v58  ;;  %v2542_v2 = vpop.f32.mrf.mxu1 }
 0x253   : > { %4713 = vst [vmem:[%s5923_s17 + $0x1e8] sm:$0xff] %v4578_v63   ;;  %v4573_v3 = vpack.c.bf16 %v2542_v2, %v2539_v59  ;;  %v5002_v4 = vpop.f32.mrf.mxu0 }
 0x254   : > { %4649 = vst [vmem:[%s5920_s13 + $0x1e0] sm:$0xff] %v4253_v1   ;;  %v5146_v5 = vpop.f32.mrf.mxu1 }
 0x255   : > { %4712 = vst [vmem:[%s5923_s17 + $0x1e0] sm:$0xff] %v4573_v3   ;;  %v1114_v6 = vpop.f32.mrf.mxu0 }
 0x256   : > { %v2555_v7 = vpop.f32.mrf.mxu1 }
 0x257   : > { %v5003_v8 = vpop.f32.mrf.mxu0 }
 0x258   : > { %v4268_v9 = vpack.c.bf16 %v5003_v8, %v5002_v4  ;;  %v5147_v10 = vpop.f32.mrf.mxu1 }
 0x259   : > { %v4588_v11 = vpack.c.bf16 %v5147_v10, %v5146_v5  ;;  %v1117_v12 = vpop.f32.mrf.mxu0 }
 0x25a   : > { %4652 = vst [vmem:[%s5920_s13 + $0x1f8] sm:$0xff] %v4268_v9   ;;  %v4263_v13 = vpack.c.bf16 %v1117_v12, %v1114_v6  ;;  %v2558_v14 = vpop.f32.mrf.mxu1 }
 0x25b   : > { %4715 = vst [vmem:[%s5923_s17 + $0x1f8] sm:$0xff] %v4588_v11   ;;  %v4583_v15 = vpack.c.bf16 %v2558_v14, %v2555_v7 }
 0x25c   : > { %4651 = vst [vmem:[%s5920_s13 + $0x1f0] sm:$0xff] %v4263_v13  }
 0x25d   : > { %4714 = vst [vmem:[%s5923_s17 + $0x1f0] sm:$0xff] %v4583_v15  }
 0x25e   : > { %5368 = shalt.err (!%p5365_p3)
}
 0x25f   : > { %s5369_s11 = scalar_lea.hbm %s6097_s29, 8192  ;;  %s5373_s17 = scalar_lea.hbm %s6185_s4, 16384 }
 0x260   : > { %p5370_p2 = scmp.ne.s32.totalorder %s6097_s29, %s5369_s11  ;;  %p5374_p11 = scmp.lt.s32.totalorder %s6097_s29, %s6185_s4 }
 0x261   : > { %p5375_p10 = scmp.lt.s32.totalorder %s5373_s17, %s5369_s11 }
 0x262   : > { %p5371_p0 = pnand %p5370_p2, %p6206_p7 }
 0x263   : > { %p5376_p6 = por %p5375_p10, %p5374_p11 }
 0x264   : > { %p5372_p8 = pneg %p5371_p0 }
 0x266   : > { %p5377_p12 = pnand %p5376_p6, %p5372_p8 }
 0x268   : > { %5380 = shalt.err (!%p5377_p12)
}
 0x269   : > { %s5472_s6 = smov 64   ;;  %s5473_s22 = smov 4  }
 0x26a   : > { %5160 = dma.vmem_to_hbm [thread:$0]  (%p6206_p7), %s6100_s14, 8192, %s6097_s29, %s3211_s8, %s5472_s6, %s5472_s6, %s5473_s22  }
 0x26b   : > { %s3216_s9 = scalar_lea.sflag [#allocation12], %s5682_s2  ;;  %s5381_s10 = scalar_lea.vmem %s6109_s7, 8192 }
 0x26c   : > { %p5382_p9 = scmp.ne.s32.totalorder %s6109_s7, %s5381_s10  ;;  %s5474_s30 = smov [#allocation11]  }
 0x26d   : > { %s5385_s0 = sshll.u32 %s5474_s30, 4  ;;  %s5386_s0 = int_to_ptr.vmem [resolvable:$false] %s5385_s0 }
 0x26e   : > { %p5383_p13 = pnand %p5382_p9, %p6206_p7  ;;  %s5387_s26 = scalar_lea.vmem %s5386_s0, 16384 }
 0x26f   : > { %p5388_p1 = scmp.lt.s32.totalorder %s6109_s7, %s5386_s0  ;;  %p5389_p4 = scmp.lt.s32.totalorder %s5387_s26, %s5381_s10 }
 0x270   : > { %p5384_p5 = pneg %p5383_p13 }
 0x271   : > { %p5390_p3 = por %p5389_p4, %p5388_p1 }
 0x273   : > { %p5391_p2 = pnand %p5390_p3, %p5384_p5 }
 0x275   : > { %5394 = shalt.err (!%p5391_p2)
}
 0x276   : > { %s5395_s14 = scalar_lea.hbm %s6107_s16, 8192  ;;  %s5399_s8 = scalar_lea.hbm %s6186_s5, 16384 }
 0x277   : > { %p5396_p0 = scmp.ne.s32.totalorder %s6107_s16, %s5395_s14  ;;  %p5400_p10 = scmp.lt.s32.totalorder %s6107_s16, %s6186_s5 }
 0x278   : > { %p5401_p6 = scmp.lt.s32.totalorder %s5399_s8, %s5395_s14 }
 0x279   : > { %p5397_p8 = pnand %p5396_p0, %p6206_p7 }
 0x27a   : > { %p5402_p12 = por %p5401_p6, %p5400_p10 }
 0x27b   : > { %p5398_p11 = pneg %p5397_p8 }
 0x27d   : > { %p5403_p9 = pnand %p5402_p12, %p5398_p11 }
 0x27f   : > { %5406 = shalt.err (!%p5403_p9)
}
 0x280   : > { %5161 = dma.vmem_to_hbm [thread:$0]  (%p6206_p7), %s6109_s7, 8192, %s6107_s16, %s3216_s9, %s5472_s6, %s5472_s6, %s5473_s22  }
 0x281 PF: > { %s3260_s13 = sand.u32 1, %s5449_s18   ;;  %p6207_p13 = scmp.ne.s32.totalorder %s6193_s25, 0 }
 0x282   : > { %p6208_p5 = scmp.ge.s32.totalorder %s5461_s21, 2  ;;  %s3261_s17 = scalar_lea.sflag [#allocation4], %s3260_s13 }
 0x284   : > { %p5179_p1 = pnand %p6208_p5, %p6207_p13 }
 0x286   : > { %p5180_p4 = pneg %p5179_p1 }
 0x288   : > { %5440 = dma.done.wait (%p5180_p4), %s3261_s17, 8192  }
 0x289   : > { %5442 = vsyncadd (%p5180_p4), %s3261_s17, 4294959104  ;;  %s3270_s28 = scalar_lea.sflag [#allocation12], %s3260_s13 }
 0x28a   : > { %5444 = dma.done.wait (%p5180_p4), %s3270_s28, 8192  }
 0x28b   : > { %5446 = vsyncadd (%p5180_p4), %s3270_s28, 4294959104  ;;  %p26_p7 = scmp.ge.s32.totalorder %s5577_s15, 4   ;;  %s6209_s18 = smov %s5453_s19 }
 0x28c   : > { %s6210_s19 = smov %s5457_s20  ;;  %s6211_s20 = smov %s5593_s27 }
 0x28d   : > { %s6212_s21 = smov %s5577_s15  ;;  %28 = sbr.rel (!%p26_p7) target bundleno = 13 (0xd), region = 119 }
 0x292   :  { %3275 = vsyncpa [#allocation3], 1 }
 0x293   :  { %3277 = vsyncpa [#allocation3 + $0x1], 1 }
 0x294   :  { %3278 = vsyncpa [#allocation6], 1 }
 0x295   :  { %3280 = vsyncpa [#allocation6 + $0x1], 1 }
 0x296   :  { %3281 = vsyncpa [#allocation9], 1 }
 0x297   :  { %3282 = vsyncpa [#allocation4], 1 }
 0x298   :  { %3284 = vsyncpa [#allocation4 + $0x1], 1 }
 0x299   :  { %3285 = vsyncpa [#allocation12], 1 }
 0x29a   :  { %3287 = vsyncpa [#allocation12 + $0x1], 1 }

</bundles_post_ra>
